<compile_context>
chip_gen: v6e
topology: v6e:2x2x1
jax: 0.10.0
libtpu: 0.0.40
codegen_flags: <defaults>
</compile_context>

<pallas_src>
import functools
import math

import jax
import jax.numpy as jnp
from jax import lax
from jax.experimental import pallas as pl
from jax.experimental.pallas import tpu as pltpu

# ----------------------- synthetic small config -----------------------------
PATCH_SIZE = 8
NUM_CHANNELS = 2
IMAGE_FEATURE_SIZE = PATCH_SIZE * PATCH_SIZE * NUM_CHANNELS      # 128
HIDDEN = 128
NUM_HEADS = 2
HEAD_DIM = HIDDEN // NUM_HEADS                                   # 64
INTERMEDIATE = 4 * HIDDEN                                        # 512
NUM_LAYERS = 2
VOCAB = 256
PARTIAL_ROTARY = 0.5
ROTARY_DIM = int(HEAD_DIM * PARTIAL_ROTARY)                      # 32
ROPE_THETA = 25000.0
EPS = 1e-5
# stand-ins for _IMAGE_TOKEN_ID=71011 / _NEWLINE_TOKEN_ID=71019 in the small vocab
IMAGE_TOKEN_ID = 200
NEWLINE_TOKEN_ID = 201

MAX_SINGLE_TILE = 512   # "full M" tile cap; above this use 128-row tiles


# ------------------------------ tiling helpers --------------------------------
def _padded_rows_and_tile(m):
    """Pad row count to a sublane/tile-friendly size and pick the row tile."""
    mp = ((m + 7) // 8) * 8
    if mp <= MAX_SINGLE_TILE:
        return mp, mp                       # one big tile, grid length 1
    mp = ((m + 127) // 128) * 128
    return mp, 128


def _pad_rows(x, mp):
    m = x.shape[0]
    if m == mp:
        return x
    pad = [(0, mp - m)] + [(0, 0)] * (x.ndim - 1)
    return jnp.pad(x, pad)


def _ln(x, g, b):
    """f32 LayerNorm over the last axis (elementwise math kept in f32)."""
    mu = jnp.mean(x, axis=-1, keepdims=True)
    var = jnp.mean(jnp.square(x - mu), axis=-1, keepdims=True)
    return (x - mu) * lax.rsqrt(var + EPS) * g + b


def _mm(x_f32_or_bf16, w_bf16):
    """bf16-operand MXU matmul with f32 accumulation."""
    return jnp.dot(x_f32_or_bf16.astype(jnp.bfloat16), w_bf16,
                   preferred_element_type=jnp.float32)


# ----------------------------- Pallas kernels --------------------------------
def _linear_kernel(x_ref, w_ref, b_ref, o_ref, *, activation):
    y = _mm(x_ref[...], w_ref[...]) + b_ref[...].astype(jnp.float32)
    if activation == "relu2":                     # Persimmon hidden_act = relu^2
        y = jnp.square(jnp.maximum(y, 0.0))
    o_ref[...] = y.astype(o_ref.dtype)


def _layernorm_kernel(x_ref, g_ref, b_ref, o_ref):
    x = x_ref[...].astype(jnp.float32)
    o_ref[...] = _ln(x, g_ref[...], b_ref[...]).astype(o_ref.dtype)


def _qkv_prep_kernel(x_ref, cos_ref, sin_ref,
                     in_g_ref, in_b_ref, wqkv_ref, bqkv_ref,
                     qg_ref, qb_ref, kg_ref, kb_ref,
                     q_out_ref, k_out_ref, v_out_ref):
    """Fused: input LN -> QKV matmul -> per-head qk-LayerNorm -> partial RoPE.

    Heads stay packed in the lane axis ([tm, NUM_HEADS*HEAD_DIM] = [tm, 128]).
    """
    x = x_ref[...].astype(jnp.float32)
    h = _ln(x, in_g_ref[...], in_b_ref[...])

    qkv = _mm(h, wqkv_ref[...]) + bqkv_ref[...].astype(jnp.float32)
    q = qkv[:, :HIDDEN]
    k = qkv[:, HIDDEN:2 * HIDDEN]
    v = qkv[:, 2 * HIDDEN:]

    cos = cos_ref[...]
    sin = sin_ref[...]

    def head_ln_rope(xh, g, b):
        xh = _ln(xh, g, b)                                  # per-head LayerNorm
        rot, keep = xh[:, :ROTARY_DIM], xh[:, ROTARY_DIM:]  # NeoX partial RoPE
        x1 = rot[:, :ROTARY_DIM // 2]
        x2 = rot[:, ROTARY_DIM // 2:]
        rot = rot * cos + jnp.concatenate([-x2, x1], axis=-1) * sin
        return jnp.concatenate([rot, keep], axis=-1)

    q_heads, k_heads = [], []
    for hd in range(NUM_HEADS):                              # static 2-iter loop
        sl = slice(hd * HEAD_DIM, (hd + 1) * HEAD_DIM)
        q_heads.append(head_ln_rope(q[:, sl], qg_ref[...], qb_ref[...]))
        k_heads.append(head_ln_rope(k[:, sl], kg_ref[...], kb_ref[...]))

    q_out_ref[...] = jnp.concatenate(q_heads, axis=-1).astype(q_out_ref.dtype)
    k_out_ref[...] = jnp.concatenate(k_heads, axis=-1).astype(k_out_ref.dtype)
    v_out_ref[...] = v.astype(v_out_ref.dtype)


def _attn_kernel(q_ref, k_ref, v_ref, o_ref):
    """Causal attention. q tile [tq, H*D], full k/v [T, H*D]; heads packed in
    lanes, both heads processed in one grid step (lane-dense output)."""
    i = pl.program_id(0)
    tq = q_ref.shape[0]
    tkv = k_ref.shape[0]
    scale = 1.0 / math.sqrt(HEAD_DIM)

    q = q_ref[...]                                    # bf16
    k = k_ref[...]
    v = v_ref[...]

    row = lax.broadcasted_iota(jnp.int32, (tq, tkv), 0) + i * tq
    col = lax.broadcasted_iota(jnp.int32, (tq, tkv), 1)
    causal = col <= row

    outs = []
    for hd in range(NUM_HEADS):
        sl = slice(hd * HEAD_DIM, (hd + 1) * HEAD_DIM)
        s = jnp.dot(q[:, sl], k[:, sl].T,
                    preferred_element_type=jnp.float32) * scale      # f32 scores
        s = jnp.where(causal, s, -1e30)
        m = jnp.max(s, axis=-1, keepdims=True)
        p = jnp.exp(s - m)
        p = p * pl.reciprocal(jnp.sum(p, axis=-1, keepdims=True), approx=True)
        outs.append(jnp.dot(p.astype(jnp.bfloat16), v[:, sl],
                            preferred_element_type=jnp.float32))
    o_ref[...] = jnp.concatenate(outs, axis=-1).astype(o_ref.dtype)


def _post_attn_kernel(attn_ref, res_ref,
                      wd_ref, bd_ref, pg_ref, pb_ref,
                      w1_ref, b1_ref, w2_ref, b2_ref, o_ref):
    """Fused: out-proj + residual -> post-LN -> fc1(relu^2) -> fc2 + residual."""
    attn = attn_ref[...]                                              # bf16
    x = res_ref[...].astype(jnp.float32) + \
        _mm(attn, wd_ref[...]) + bd_ref[...].astype(jnp.float32)

    h = _ln(x, pg_ref[...], pb_ref[...])
    h = _mm(h, w1_ref[...]) + b1_ref[...].astype(jnp.float32)
    h = jnp.square(jnp.maximum(h, 0.0))                               # relu^2
    h = _mm(h, w2_ref[...]) + b2_ref[...].astype(jnp.float32)

    o_ref[...] = (x + h).astype(o_ref.dtype)


# ------------------------------ pallas wrappers -------------------------------
_PARALLEL = pltpu.CompilerParams(dimension_semantics=("parallel",))


def linear(x, w_bf16, b, activation=None):
    m, kdim = x.shape
    n = w_bf16.shape[1]
    mp, tm = _padded_rows_and_tile(m)
    xp = _pad_rows(x, mp)
    out = pl.pallas_call(
        functools.partial(_linear_kernel, activation=activation),
        out_shape=jax.ShapeDtypeStruct((mp, n), jnp.float32),
        grid=(mp // tm,),
        in_specs=[
            pl.BlockSpec((tm, kdim), lambda i: (i, 0)),
            pl.BlockSpec((kdim, n), lambda i: (0, 0)),
            pl.BlockSpec((1, n), lambda i: (0, 0)),
        ],
        out_specs=pl.BlockSpec((tm, n), lambda i: (i, 0)),
        compiler_params=_PARALLEL,
    )(xp, w_bf16, b.reshape(1, n))
    return out[:m]


def layernorm(x, g, b, tm):
    mp, d = x.shape
    return pl.pallas_call(
        _layernorm_kernel,
        out_shape=jax.ShapeDtypeStruct((mp, d), jnp.float32),
        grid=(mp // tm,),
        in_specs=[
            pl.BlockSpec((tm, d), lambda i: (i, 0)),
            pl.BlockSpec((1, d), lambda i: (0, 0)),
            pl.BlockSpec((1, d), lambda i: (0, 0)),
        ],
        out_specs=pl.BlockSpec((tm, d), lambda i: (i, 0)),
        compiler_params=_PARALLEL,
    )(x, g.reshape(1, d), b.reshape(1, d))


def decoder_layer(x, cos, sin, p, tm):
    mp = x.shape[0]
    grid = (mp // tm,)

    # (A) LN + QKV + per-head qk-LN + partial RoPE  -> q/k/v packed [mp, 128]
    q, k, v = pl.pallas_call(
        _qkv_prep_kernel,
        out_shape=tuple(jax.ShapeDtypeStruct((mp, HIDDEN), jnp.bfloat16)
                        for _ in range(3)),
        grid=grid,
        in_specs=[
            pl.BlockSpec((tm, HIDDEN), lambda i: (i, 0)),           # x
            pl.BlockSpec((tm, ROTARY_DIM), lambda i: (i, 0)),       # cos
            pl.BlockSpec((tm, ROTARY_DIM), lambda i: (i, 0)),       # sin
            pl.BlockSpec((1, HIDDEN), lambda i: (0, 0)),            # in_ln_g
            pl.BlockSpec((1, HIDDEN), lambda i: (0, 0)),            # in_ln_b
            pl.BlockSpec((HIDDEN, 3 * HIDDEN), lambda i: (0, 0)),   # qkv_w
            pl.BlockSpec((1, 3 * HIDDEN), lambda i: (0, 0)),        # qkv_b
            pl.BlockSpec((1, HEAD_DIM), lambda i: (0, 0)),          # q_ln_g
            pl.BlockSpec((1, HEAD_DIM), lambda i: (0, 0)),          # q_ln_b
            pl.BlockSpec((1, HEAD_DIM), lambda i: (0, 0)),          # k_ln_g
            pl.BlockSpec((1, HEAD_DIM), lambda i: (0, 0)),          # k_ln_b
        ],
        out_specs=tuple(pl.BlockSpec((tm, HIDDEN), lambda i: (i, 0))
                        for _ in range(3)),
        compiler_params=_PARALLEL,
    )(x, cos, sin,
      p["in_ln_g"].reshape(1, -1), p["in_ln_b"].reshape(1, -1),
      p["qkv_w_bf16"], p["qkv_b"].reshape(1, -1),
      p["q_ln_g"].reshape(1, -1), p["q_ln_b"].reshape(1, -1),
      p["k_ln_g"].reshape(1, -1), p["k_ln_b"].reshape(1, -1))

    # (B) causal attention, heads packed in the lane axis
    attn_out = pl.pallas_call(
        _attn_kernel,
        out_shape=jax.ShapeDtypeStruct((mp, HIDDEN), jnp.bfloat16),
        grid=grid,
        in_specs=[
            pl.BlockSpec((tm, HIDDEN), lambda i: (i, 0)),           # q tile
            pl.BlockSpec((mp, HIDDEN), lambda i: (0, 0)),           # full k
            pl.BlockSpec((mp, HIDDEN), lambda i: (0, 0)),           # full v
        ],
        out_specs=pl.BlockSpec((tm, HIDDEN), lambda i: (i, 0)),
        compiler_params=_PARALLEL,
    )(q, k, v)

    # (C) out-proj + residual + post-LN + MLP(relu^2) + residual
    x = pl.pallas_call(
        _post_attn_kernel,
        out_shape=jax.ShapeDtypeStruct((mp, HIDDEN), jnp.float32),
        grid=grid,
        in_specs=[
            pl.BlockSpec((tm, HIDDEN), lambda i: (i, 0)),             # attn_out
            pl.BlockSpec((tm, HIDDEN), lambda i: (i, 0)),             # residual
            pl.BlockSpec((HIDDEN, HIDDEN), lambda i: (0, 0)),         # dense_w
            pl.BlockSpec((1, HIDDEN), lambda i: (0, 0)),              # dense_b
            pl.BlockSpec((1, HIDDEN), lambda i: (0, 0)),              # post_ln_g
            pl.BlockSpec((1, HIDDEN), lambda i: (0, 0)),              # post_ln_b
            pl.BlockSpec((HIDDEN, INTERMEDIATE), lambda i: (0, 0)),   # fc1_w
            pl.BlockSpec((1, INTERMEDIATE), lambda i: (0, 0)),        # fc1_b
            pl.BlockSpec((INTERMEDIATE, HIDDEN), lambda i: (0, 0)),   # fc2_w
            pl.BlockSpec((1, HIDDEN), lambda i: (0, 0)),              # fc2_b
        ],
        out_specs=pl.BlockSpec((tm, HIDDEN), lambda i: (i, 0)),
        compiler_params=_PARALLEL,
    )(attn_out, x,
      p["dense_w_bf16"], p["dense_b"].reshape(1, -1),
      p["post_ln_g"].reshape(1, -1), p["post_ln_b"].reshape(1, -1),
      p["fc1_w_bf16"], p["fc1_b"].reshape(1, -1),
      p["fc2_w_bf16"], p["fc2_b"].reshape(1, -1))
    return x


# --------------------------------- glue --------------------------------------
def rope_cos_sin(positions):
    # Hoisted out of the layer loop: only depends on positions.
    inv_freq = 1.0 / (ROPE_THETA ** (
        jnp.arange(0, ROTARY_DIM, 2, dtype=jnp.float32) / ROTARY_DIM))
    freqs = positions.astype(jnp.float32)[:, None] * inv_freq[None, :]
    emb = jnp.concatenate([freqs, freqs], axis=-1)      # [T, ROTARY_DIM]
    return jnp.cos(emb), jnp.sin(emb)


def _with_bf16_weights(p):
    q = dict(p)
    for name in ("qkv_w", "dense_w", "fc1_w", "fc2_w"):
        q[name + "_bf16"] = p[name].astype(jnp.bfloat16)
    return q


def fuyu_forward(params, input_ids, positions, image_patches_flat):
    # vision_embed_tokens: Linear(image_feature_size -> hidden)  [Pallas matmul]
    vision_emb = linear(image_patches_flat,
                        params["vision_w"].astype(jnp.bfloat16),
                        params["vision_b"])

    # language_model.get_input_embeddings + merge_multimodal_embeddings (glue)
    tok_emb = params["embed_tokens"][input_ids]          # gather (JAX glue)
    is_img = input_ids == IMAGE_TOKEN_ID
    vis_idx = jnp.clip(jnp.cumsum(is_img.astype(jnp.int32)) - 1,
                       0, vision_emb.shape[0] - 1)
    x = jnp.where(is_img[:, None], vision_emb[vis_idx], tok_emb)

    # Pad the token dimension once; all per-layer kernels use big row tiles.
    t = x.shape[0]
    mp, tm = _padded_rows_and_tile(t)
    x = _pad_rows(x, mp)
    pos_p = jnp.pad(positions, (0, mp - t))
    cos, sin = rope_cos_sin(pos_p)

    layers = [_with_bf16_weights(p) for p in params["layers"]]
    for p in layers:
        x = decoder_layer(x, cos, sin, p, tm)

    x = layernorm(x, params["final_ln_g"], params["final_ln_b"], tm)
    return x[:t]   # hidden_states, as returned by FuyuForCausalLM.forward


# ------------------------------ param init -----------------------------------
def init_params(key):
    def nrm(k, shape, scale=0.02):
        return scale * jax.random.normal(k, shape, dtype=jnp.float32)

    keys = iter(jax.random.split(key, 64))
    params = {
        "vision_w": nrm(next(keys), (IMAGE_FEATURE_SIZE, HIDDEN)),
        "vision_b": nrm(next(keys), (HIDDEN,)),
        "embed_tokens": nrm(next(keys), (VOCAB, HIDDEN)),
        "final_ln_g": jnp.ones((HIDDEN,), jnp.float32),
        "final_ln_b": jnp.zeros((HIDDEN,), jnp.float32),
        "layers": [],
    }
    for _ in range(NUM_LAYERS):
        params["layers"].append({
            "in_ln_g": jnp.ones((HIDDEN,), jnp.float32),
            "in_ln_b": jnp.zeros((HIDDEN,), jnp.float32),
            "qkv_w": nrm(next(keys), (HIDDEN, 3 * HIDDEN)),
            "qkv_b": nrm(next(keys), (3 * HIDDEN,)),
            "q_ln_g": jnp.ones((HEAD_DIM,), jnp.float32),
            "q_ln_b": jnp.zeros((HEAD_DIM,), jnp.float32),
            "k_ln_g": jnp.ones((HEAD_DIM,), jnp.float32),
            "k_ln_b": jnp.zeros((HEAD_DIM,), jnp.float32),
            "dense_w": nrm(next(keys), (HIDDEN, HIDDEN)),
            "dense_b": nrm(next(keys), (HIDDEN,)),
            "post_ln_g": jnp.ones((HIDDEN,), jnp.float32),
            "post_ln_b": jnp.zeros((HIDDEN,), jnp.float32),
            "fc1_w": nrm(next(keys), (HIDDEN, INTERMEDIATE)),
            "fc1_b": nrm(next(keys), (INTERMEDIATE,)),
            "fc2_w": nrm(next(keys), (INTERMEDIATE, HIDDEN)),
            "fc2_b": nrm(next(keys), (HIDDEN,)),
        })
    return params


# ---------------------------------- main --------------------------------------
if __name__ == "__main__":
    key = jax.random.PRNGKey(0)
    k_param, k_img, k_txt = jax.random.split(key, 3)

    params = init_params(k_param)

    # one image tiled into a 4x2 patch grid -> 8 patches; prompt layout matches
    # Fuyu: ([IMAGE]*ncols + [NEWLINE]) * nrows + text tokens
    ncols, nrows = 4, 2
    num_patches = ncols * nrows                                   # 8
    image_patches = jax.random.normal(
        k_img, (num_patches, IMAGE_FEATURE_SIZE), dtype=jnp.float32)

    img_row = [IMAGE_TOKEN_ID] * ncols + [NEWLINE_TOKEN_ID]
    prompt = img_row * nrows                                      # 10 tokens
    text = list(jax.random.randint(k_txt, (6,), 0, 100))          # 6 text tokens
    input_ids = jnp.array(prompt + [int(t) for t in text], dtype=jnp.int32)  # [16]
    positions = jnp.arange(input_ids.shape[0], dtype=jnp.int32)

    fwd = jax.jit(fuyu_forward)
    hidden_states = fwd(params, input_ids, positions, image_patches)
    jax.block_until_ready(hidden_states)

    assert hidden_states.shape == (input_ids.shape[0], HIDDEN)
    assert bool(jnp.all(jnp.isfinite(hidden_states)))
    # TODO(synk): compute_logits / lm_head projection is a separate method in
    # vLLM and is not part of forward(); omitted here.
    print("KERNEL_OK")
</pallas_src>

<mosaic_0001>
module attributes {stable_mosaic.version = 11 : i64} {
  func.func @_attn_kernel(%arg0: i32, %arg1: memref<16x128xbf16, #tpu.memory_space<vmem>>, %arg2: memref<16x128xbf16, #tpu.memory_space<vmem>>, %arg3: memref<16x128xbf16, #tpu.memory_space<vmem>>, %arg4: memref<16x128xbf16, #tpu.memory_space<vmem>>) attributes {dimension_semantics = [#tpu.dimension_semantics<parallel>], iteration_bounds = array<i64: 1>, scalar_prefetch = 0 : i64, scratch_operands = 0 : i64, tpu.core_type = #tpu.core_type<tc>, window_params = [{transform_indices = @transform_0, window_bounds = array<i64: 16, 128>}, {pipeline_mode = #tpu.pipeline_mode<synchronous>, transform_indices = @transform_1, window_bounds = array<i64: 16, 128>}, {pipeline_mode = #tpu.pipeline_mode<synchronous>, transform_indices = @transform_2, window_bounds = array<i64: 16, 128>}, {transform_indices = @transform_3, window_bounds = array<i64: 16, 128>}]} {
    %c0 = arith.constant 0 : index
    %c0_0 = arith.constant 0 : index
    %0 = vector.load %arg1[%c0, %c0_0] : memref<16x128xbf16, #tpu.memory_space<vmem>>, vector<16x128xbf16>
    %c0_1 = arith.constant 0 : index
    %c0_2 = arith.constant 0 : index
    %1 = vector.load %arg2[%c0_1, %c0_2] : memref<16x128xbf16, #tpu.memory_space<vmem>>, vector<16x128xbf16>
    %c0_3 = arith.constant 0 : index
    %c0_4 = arith.constant 0 : index
    %2 = vector.load %arg3[%c0_3, %c0_4] : memref<16x128xbf16, #tpu.memory_space<vmem>>, vector<16x128xbf16>
    %3 = tpu.iota {dimensions = array<i32: 0>} : vector<16x16xi32>
    %c16_i32 = arith.constant 16 : i32
    %4 = arith.muli %arg0, %c16_i32 : i32
    %5 = vector.broadcast %4 : i32 to vector<16x16xi32>
    %6 = arith.addi %3, %5 : vector<16x16xi32>
    %7 = tpu.iota {dimensions = array<i32: 1>} : vector<16x16xi32>
    %8 = arith.cmpi sle, %7, %6 : vector<16x16xi32>
    %9 = vector.extract_strided_slice %0 {offsets = [0, 0], sizes = [16, 64], strides = [1, 1]} : vector<16x128xbf16> to vector<16x64xbf16>
    %10 = vector.extract_strided_slice %1 {offsets = [0, 0], sizes = [16, 64], strides = [1, 1]} : vector<16x128xbf16> to vector<16x64xbf16>
    %11 = tpu.transpose %10, [1, 0] : vector<16x64xbf16> -> vector<64x16xbf16>
    %cst = arith.constant dense<0.000000e+00> : vector<16x16xf32>
    %12 = tpu.matmul %9, %11, %cst {dimension_numbers = #tpu.dot_dimension_numbers<[1], [0], [0], [1], [0, 0, 1, 1], [], []>} : vector<16x64xbf16>, vector<64x16xbf16>, vector<16x16xf32> -> vector<16x16xf32>
    %cst_5 = arith.constant 1.250000e-01 : f32
    %13 = vector.broadcast %cst_5 : f32 to vector<16x16xf32>
    %14 = arith.mulf %12, %13 : vector<16x16xf32>
    %cst_6 = arith.constant -1.000000e+30 : f32
    %15 = vector.broadcast %cst_6 : f32 to vector<16x16xf32>
    %16 = arith.select %8, %14, %15 : vector<16x16xi1>, vector<16x16xf32>
    %cst_7 = arith.constant dense<0xFF800000> : vector<16xf32>
    %17 = vector.multi_reduction <maximumf>, %16, %cst_7 [1] : vector<16x16xf32> to vector<16xf32>
    %18 = vector.shape_cast %17 : vector<16xf32> to vector<16x1xf32>
    %19 = vector.broadcast %18 : vector<16x1xf32> to vector<16x16xf32>
    %20 = arith.subf %16, %19 : vector<16x16xf32>
    %21 = math.exp %20 : vector<16x16xf32>
    %cst_8 = arith.constant dense<0.000000e+00> : vector<16xf32>
    %22 = vector.multi_reduction <add>, %21, %cst_8 [1] : vector<16x16xf32> to vector<16xf32>
    %23 = vector.shape_cast %22 : vector<16xf32> to vector<16x1xf32>
    %24 = tpu.reciprocal %23 {approx = true} : vector<16x1xf32> -> vector<16x1xf32>
    %25 = vector.broadcast %24 : vector<16x1xf32> to vector<16x16xf32>
    %26 = arith.mulf %21, %25 : vector<16x16xf32>
    %27 = arith.truncf %26 : vector<16x16xf32> to vector<16x16xbf16>
    %28 = vector.extract_strided_slice %2 {offsets = [0, 0], sizes = [16, 64], strides = [1, 1]} : vector<16x128xbf16> to vector<16x64xbf16>
    %cst_9 = arith.constant dense<0.000000e+00> : vector<16x64xf32>
    %29 = tpu.matmul %27, %28, %cst_9 {dimension_numbers = #tpu.dot_dimension_numbers<[1], [0], [0], [1], [0, 0, 1, 1], [], []>} : vector<16x16xbf16>, vector<16x64xbf16>, vector<16x64xf32> -> vector<16x64xf32>
    %30 = vector.extract_strided_slice %0 {offsets = [0, 64], sizes = [16, 64], strides = [1, 1]} : vector<16x128xbf16> to vector<16x64xbf16>
    %31 = vector.extract_strided_slice %1 {offsets = [0, 64], sizes = [16, 64], strides = [1, 1]} : vector<16x128xbf16> to vector<16x64xbf16>
    %32 = tpu.transpose %31, [1, 0] : vector<16x64xbf16> -> vector<64x16xbf16>
    %cst_10 = arith.constant dense<0.000000e+00> : vector<16x16xf32>
    %33 = tpu.matmul %30, %32, %cst_10 {dimension_numbers = #tpu.dot_dimension_numbers<[1], [0], [0], [1], [0, 0, 1, 1], [], []>} : vector<16x64xbf16>, vector<64x16xbf16>, vector<16x16xf32> -> vector<16x16xf32>
    %cst_11 = arith.constant 1.250000e-01 : f32
    %34 = vector.broadcast %cst_11 : f32 to vector<16x16xf32>
    %35 = arith.mulf %33, %34 : vector<16x16xf32>
    %cst_12 = arith.constant -1.000000e+30 : f32
    %36 = vector.broadcast %cst_12 : f32 to vector<16x16xf32>
    %37 = arith.select %8, %35, %36 : vector<16x16xi1>, vector<16x16xf32>
    %cst_13 = arith.constant dense<0xFF800000> : vector<16xf32>
    %38 = vector.multi_reduction <maximumf>, %37, %cst_13 [1] : vector<16x16xf32> to vector<16xf32>
    %39 = vector.shape_cast %38 : vector<16xf32> to vector<16x1xf32>
    %40 = vector.broadcast %39 : vector<16x1xf32> to vector<16x16xf32>
    %41 = arith.subf %37, %40 : vector<16x16xf32>
    %42 = math.exp %41 : vector<16x16xf32>
    %cst_14 = arith.constant dense<0.000000e+00> : vector<16xf32>
    %43 = vector.multi_reduction <add>, %42, %cst_14 [1] : vector<16x16xf32> to vector<16xf32>
    %44 = vector.shape_cast %43 : vector<16xf32> to vector<16x1xf32>
    %45 = tpu.reciprocal %44 {approx = true} : vector<16x1xf32> -> vector<16x1xf32>
    %46 = vector.broadcast %45 : vector<16x1xf32> to vector<16x16xf32>
    %47 = arith.mulf %42, %46 : vector<16x16xf32>
    %48 = arith.truncf %47 : vector<16x16xf32> to vector<16x16xbf16>
    %49 = vector.extract_strided_slice %2 {offsets = [0, 64], sizes = [16, 64], strides = [1, 1]} : vector<16x128xbf16> to vector<16x64xbf16>
    %cst_15 = arith.constant dense<0.000000e+00> : vector<16x64xf32>
    %50 = tpu.matmul %48, %49, %cst_15 {dimension_numbers = #tpu.dot_dimension_numbers<[1], [0], [0], [1], [0, 0, 1, 1], [], []>} : vector<16x16xbf16>, vector<16x64xbf16>, vector<16x64xf32> -> vector<16x64xf32>
    %51 = tpu.concatenate %29, %50 in 1 : vector<16x64xf32>, vector<16x64xf32> -> vector<16x128xf32>
    %52 = arith.truncf %51 : vector<16x128xf32> to vector<16x128xbf16>
    %c0_16 = arith.constant 0 : index
    %c0_17 = arith.constant 0 : index
    %53 = vector.load %arg4[%c0_16, %c0_17] : memref<16x128xbf16, #tpu.memory_space<vmem>>, vector<16x128xbf16>
    tpu.vector_store %arg4[%c0_16, %c0_17], %52 {strides = array<i32>} : memref<16x128xbf16, #tpu.memory_space<vmem>>, vector<16x128xbf16>,
    return
  }
  func.func @transform_0(%arg0: i32) -> (i32, i32) {
    %c0_i32 = arith.constant 0 : i32
    %c0_i32_0 = arith.constant 0 : i32
    return %arg0, %c0_i32 : i32, i32
  }
  func.func @transform_1(%arg0: i32) -> (i32, i32) {
    %c0_i32 = arith.constant 0 : i32
    %c0_i32_0 = arith.constant 0 : i32
    %c0_i32_1 = arith.constant 0 : i32
    return %c0_i32, %c0_i32_0 : i32, i32
  }
  func.func @transform_2(%arg0: i32) -> (i32, i32) {
    %c0_i32 = arith.constant 0 : i32
    %c0_i32_0 = arith.constant 0 : i32
    %c0_i32_1 = arith.constant 0 : i32
    return %c0_i32, %c0_i32_0 : i32, i32
  }
  func.func @transform_3(%arg0: i32) -> (i32, i32) {
    %c0_i32 = arith.constant 0 : i32
    %c0_i32_0 = arith.constant 0 : i32
    return %arg0, %c0_i32 : i32, i32
  }
}

module attributes {stable_mosaic.version = 11 : i64} {
  func.func @_linear_kernel(%arg0: i32, %arg1: memref<8x128xf32, #tpu.memory_space<vmem>>, %arg2: memref<128x128xbf16, #tpu.memory_space<vmem>>, %arg3: memref<1x128xf32, #tpu.memory_space<vmem>>, %arg4: memref<8x128xf32, #tpu.memory_space<vmem>>) attributes {dimension_semantics = [#tpu.dimension_semantics<parallel>], iteration_bounds = array<i64: 1>, scalar_prefetch = 0 : i64, scratch_operands = 0 : i64, tpu.core_type = #tpu.core_type<tc>, window_params = [{transform_indices = @transform_0, window_bounds = array<i64: 8, 128>}, {pipeline_mode = #tpu.pipeline_mode<synchronous>, transform_indices = @transform_1, window_bounds = array<i64: 128, 128>}, {pipeline_mode = #tpu.pipeline_mode<synchronous>, transform_indices = @transform_2, window_bounds = array<i64: 1, 128>}, {transform_indices = @transform_3, window_bounds = array<i64: 8, 128>}]} {
    %c0 = arith.constant 0 : index
    %c0_0 = arith.constant 0 : index
    %0 = vector.load %arg1[%c0, %c0_0] : memref<8x128xf32, #tpu.memory_space<vmem>>, vector<8x128xf32>
    %c0_1 = arith.constant 0 : index
    %c0_2 = arith.constant 0 : index
    %1 = vector.load %arg2[%c0_1, %c0_2] : memref<128x128xbf16, #tpu.memory_space<vmem>>, vector<128x128xbf16>
    %2 = arith.truncf %0 : vector<8x128xf32> to vector<8x128xbf16>
    %cst = arith.constant dense<0.000000e+00> : vector<8x128xf32>
    %3 = tpu.matmul %2, %1, %cst {dimension_numbers = #tpu.dot_dimension_numbers<[1], [0], [0], [1], [0, 0, 1, 1], [], []>} : vector<8x128xbf16>, vector<128x128xbf16>, vector<8x128xf32> -> vector<8x128xf32>
    %c0_3 = arith.constant 0 : index
    %c0_4 = arith.constant 0 : index
    %4 = vector.load %arg3[%c0_3, %c0_4] : memref<1x128xf32, #tpu.memory_space<vmem>>, vector<1x128xf32>
    %5 = vector.broadcast %4 : vector<1x128xf32> to vector<8x128xf32>
    %6 = arith.addf %3, %5 : vector<8x128xf32>
    %c0_5 = arith.constant 0 : index
    %c0_6 = arith.constant 0 : index
    %7 = vector.load %arg4[%c0_5, %c0_6] : memref<8x128xf32, #tpu.memory_space<vmem>>, vector<8x128xf32>
    tpu.vector_store %arg4[%c0_5, %c0_6], %6 {strides = array<i32>} : memref<8x128xf32, #tpu.memory_space<vmem>>, vector<8x128xf32>,
    return
  }
  func.func @transform_0(%arg0: i32) -> (i32, i32) {
    %c0_i32 = arith.constant 0 : i32
    %c0_i32_0 = arith.constant 0 : i32
    return %arg0, %c0_i32 : i32, i32
  }
  func.func @transform_1(%arg0: i32) -> (i32, i32) {
    %c0_i32 = arith.constant 0 : i32
    %c0_i32_0 = arith.constant 0 : i32
    %c0_i32_1 = arith.constant 0 : i32
    return %c0_i32, %c0_i32_0 : i32, i32
  }
  func.func @transform_2(%arg0: i32) -> (i32, i32) {
    %c0_i32 = arith.constant 0 : i32
    %c0_i32_0 = arith.constant 0 : i32
    %c0_i32_1 = arith.constant 0 : i32
    return %c0_i32, %c0_i32_0 : i32, i32
  }
  func.func @transform_3(%arg0: i32) -> (i32, i32) {
    %c0_i32 = arith.constant 0 : i32
    %c0_i32_0 = arith.constant 0 : i32
    return %arg0, %c0_i32 : i32, i32
  }
}

module attributes {stable_mosaic.version = 11 : i64} {
  func.func @_qkv_prep_kernel(%arg0: i32, %arg1: memref<16x128xf32, #tpu.memory_space<vmem>>, %arg2: memref<16x32xf32, #tpu.memory_space<vmem>>, %arg3: memref<16x32xf32, #tpu.memory_space<vmem>>, %arg4: memref<1x128xf32, #tpu.memory_space<vmem>>, %arg5: memref<1x128xf32, #tpu.memory_space<vmem>>, %arg6: memref<128x384xbf16, #tpu.memory_space<vmem>>, %arg7: memref<1x384xf32, #tpu.memory_space<vmem>>, %arg8: memref<1x64xf32, #tpu.memory_space<vmem>>, %arg9: memref<1x64xf32, #tpu.memory_space<vmem>>, %arg10: memref<1x64xf32, #tpu.memory_space<vmem>>, %arg11: memref<1x64xf32, #tpu.memory_space<vmem>>, %arg12: memref<16x128xbf16, #tpu.memory_space<vmem>>, %arg13: memref<16x128xbf16, #tpu.memory_space<vmem>>, %arg14: memref<16x128xbf16, #tpu.memory_space<vmem>>) attributes {dimension_semantics = [#tpu.dimension_semantics<parallel>], iteration_bounds = array<i64: 1>, scalar_prefetch = 0 : i64, scratch_operands = 0 : i64, tpu.core_type = #tpu.core_type<tc>, window_params = [{transform_indices = @transform_0, window_bounds = array<i64: 16, 128>}, {transform_indices = @transform_1, window_bounds = array<i64: 16, 32>}, {transform_indices = @transform_2, window_bounds = array<i64: 16, 32>}, {pipeline_mode = #tpu.pipeline_mode<synchronous>, transform_indices = @transform_3, window_bounds = array<i64: 1, 128>}, {pipeline_mode = #tpu.pipeline_mode<synchronous>, transform_indices = @transform_4, window_bounds = array<i64: 1, 128>}, {pipeline_mode = #tpu.pipeline_mode<synchronous>, transform_indices = @transform_5, window_bounds = array<i64: 128, 384>}, {pipeline_mode = #tpu.pipeline_mode<synchronous>, transform_indices = @transform_6, window_bounds = array<i64: 1, 384>}, {pipeline_mode = #tpu.pipeline_mode<synchronous>, transform_indices = @transform_7, window_bounds = array<i64: 1, 64>}, {pipeline_mode = #tpu.pipeline_mode<synchronous>, transform_indices = @transform_8, window_bounds = array<i64: 1, 64>}, {pipeline_mode = #tpu.pipeline_mode<synchronous>, transform_indices = @transform_9, window_bounds = array<i64: 1, 64>}, {pipeline_mode = #tpu.pipeline_mode<synchronous>, transform_indices = @transform_10, window_bounds = array<i64: 1, 64>}, {transform_indices = @transform_11, window_bounds = array<i64: 16, 128>}, {transform_indices = @transform_12, window_bounds = array<i64: 16, 128>}, {transform_indices = @transform_13, window_bounds = array<i64: 16, 128>}]} {
    %c0 = arith.constant 0 : index
    %c0_0 = arith.constant 0 : index
    %0 = vector.load %arg1[%c0, %c0_0] : memref<16x128xf32, #tpu.memory_space<vmem>>, vector<16x128xf32>
    %c0_1 = arith.constant 0 : index
    %c0_2 = arith.constant 0 : index
    %1 = vector.load %arg4[%c0_1, %c0_2] : memref<1x128xf32, #tpu.memory_space<vmem>>, vector<1x128xf32>
    %c0_3 = arith.constant 0 : index
    %c0_4 = arith.constant 0 : index
    %2 = vector.load %arg5[%c0_3, %c0_4] : memref<1x128xf32, #tpu.memory_space<vmem>>, vector<1x128xf32>
    %cst = arith.constant dense<0.000000e+00> : vector<16xf32>
    %3 = vector.multi_reduction <add>, %0, %cst [1] : vector<16x128xf32> to vector<16xf32>
    %4 = vector.shape_cast %3 : vector<16xf32> to vector<16x1xf32>
    %cst_5 = arith.constant 1.280000e+02 : f32
    %5 = vector.broadcast %cst_5 : f32 to vector<16x1xf32>
    %6 = arith.divf %4, %5 : vector<16x1xf32>
    %7 = vector.broadcast %6 : vector<16x1xf32> to vector<16x128xf32>
    %8 = arith.subf %0, %7 : vector<16x128xf32>
    %9 = arith.mulf %8, %8 : vector<16x128xf32>
    %cst_6 = arith.constant dense<0.000000e+00> : vector<16xf32>
    %10 = vector.multi_reduction <add>, %9, %cst_6 [1] : vector<16x128xf32> to vector<16xf32>
    %11 = vector.shape_cast %10 : vector<16xf32> to vector<16x1xf32>
    %cst_7 = arith.constant 1.280000e+02 : f32
    %12 = vector.broadcast %cst_7 : f32 to vector<16x1xf32>
    %13 = arith.divf %11, %12 : vector<16x1xf32>
    %14 = vector.broadcast %6 : vector<16x1xf32> to vector<16x128xf32>
    %15 = arith.subf %0, %14 : vector<16x128xf32>
    %cst_8 = arith.constant 9.99999974E-6 : f32
    %16 = vector.broadcast %cst_8 : f32 to vector<16x1xf32>
    %17 = arith.addf %13, %16 : vector<16x1xf32>
    %18 = math.rsqrt %17 : vector<16x1xf32>
    %19 = vector.broadcast %18 : vector<16x1xf32> to vector<16x128xf32>
    %20 = arith.mulf %15, %19 : vector<16x128xf32>
    %21 = vector.broadcast %1 : vector<1x128xf32> to vector<16x128xf32>
    %22 = arith.mulf %20, %21 : vector<16x128xf32>
    %23 = vector.broadcast %2 : vector<1x128xf32> to vector<16x128xf32>
    %24 = arith.addf %22, %23 : vector<16x128xf32>
    %c0_9 = arith.constant 0 : index
    %c0_10 = arith.constant 0 : index
    %25 = vector.load %arg6[%c0_9, %c0_10] : memref<128x384xbf16, #tpu.memory_space<vmem>>, vector<128x384xbf16>
    %26 = arith.truncf %24 : vector<16x128xf32> to vector<16x128xbf16>
    %cst_11 = arith.constant dense<0.000000e+00> : vector<16x384xf32>
    %27 = tpu.matmul %26, %25, %cst_11 {dimension_numbers = #tpu.dot_dimension_numbers<[1], [0], [0], [1], [0, 0, 1, 1], [], []>} : vector<16x128xbf16>, vector<128x384xbf16>, vector<16x384xf32> -> vector<16x384xf32>
    %c0_12 = arith.constant 0 : index
    %c0_13 = arith.constant 0 : index
    %28 = vector.load %arg7[%c0_12, %c0_13] : memref<1x384xf32, #tpu.memory_space<vmem>>, vector<1x384xf32>
    %29 = vector.broadcast %28 : vector<1x384xf32> to vector<16x384xf32>
    %30 = arith.addf %27, %29 : vector<16x384xf32>
    %31 = vector.extract_strided_slice %30 {offsets = [0, 0], sizes = [16, 128], strides = [1, 1]} : vector<16x384xf32> to vector<16x128xf32>
    %32 = vector.extract_strided_slice %30 {offsets = [0, 128], sizes = [16, 128], strides = [1, 1]} : vector<16x384xf32> to vector<16x128xf32>
    %33 = vector.extract_strided_slice %30 {offsets = [0, 256], sizes = [16, 128], strides = [1, 1]} : vector<16x384xf32> to vector<16x128xf32>
    %c0_14 = arith.constant 0 : index
    %c0_15 = arith.constant 0 : index
    %34 = vector.load %arg2[%c0_14, %c0_15] : memref<16x32xf32, #tpu.memory_space<vmem>>, vector<16x32xf32>
    %c0_16 = arith.constant 0 : index
    %c0_17 = arith.constant 0 : index
    %35 = vector.load %arg3[%c0_16, %c0_17] : memref<16x32xf32, #tpu.memory_space<vmem>>, vector<16x32xf32>
    %36 = vector.extract_strided_slice %31 {offsets = [0, 0], sizes = [16, 64], strides = [1, 1]} : vector<16x128xf32> to vector<16x64xf32>
    %c0_18 = arith.constant 0 : index
    %c0_19 = arith.constant 0 : index
    %37 = vector.load %arg8[%c0_18, %c0_19] : memref<1x64xf32, #tpu.memory_space<vmem>>, vector<1x64xf32>
    %c0_20 = arith.constant 0 : index
    %c0_21 = arith.constant 0 : index
    %38 = vector.load %arg9[%c0_20, %c0_21] : memref<1x64xf32, #tpu.memory_space<vmem>>, vector<1x64xf32>
    %cst_22 = arith.constant dense<0.000000e+00> : vector<16xf32>
    %39 = vector.multi_reduction <add>, %36, %cst_22 [1] : vector<16x64xf32> to vector<16xf32>
    %40 = vector.shape_cast %39 : vector<16xf32> to vector<16x1xf32>
    %cst_23 = arith.constant 6.400000e+01 : f32
    %41 = vector.broadcast %cst_23 : f32 to vector<16x1xf32>
    %42 = arith.divf %40, %41 : vector<16x1xf32>
    %43 = vector.broadcast %42 : vector<16x1xf32> to vector<16x64xf32>
    %44 = arith.subf %36, %43 : vector<16x64xf32>
    %45 = arith.mulf %44, %44 : vector<16x64xf32>
    %cst_24 = arith.constant dense<0.000000e+00> : vector<16xf32>
    %46 = vector.multi_reduction <add>, %45, %cst_24 [1] : vector<16x64xf32> to vector<16xf32>
    %47 = vector.shape_cast %46 : vector<16xf32> to vector<16x1xf32>
    %cst_25 = arith.constant 6.400000e+01 : f32
    %48 = vector.broadcast %cst_25 : f32 to vector<16x1xf32>
    %49 = arith.divf %47, %48 : vector<16x1xf32>
    %50 = vector.broadcast %42 : vector<16x1xf32> to vector<16x64xf32>
    %51 = arith.subf %36, %50 : vector<16x64xf32>
    %cst_26 = arith.constant 9.99999974E-6 : f32
    %52 = vector.broadcast %cst_26 : f32 to vector<16x1xf32>
    %53 = arith.addf %49, %52 : vector<16x1xf32>
    %54 = math.rsqrt %53 : vector<16x1xf32>
    %55 = vector.broadcast %54 : vector<16x1xf32> to vector<16x64xf32>
    %56 = arith.mulf %51, %55 : vector<16x64xf32>
    %57 = vector.broadcast %37 : vector<1x64xf32> to vector<16x64xf32>
    %58 = arith.mulf %56, %57 : vector<16x64xf32>
    %59 = vector.broadcast %38 : vector<1x64xf32> to vector<16x64xf32>
    %60 = arith.addf %58, %59 : vector<16x64xf32>
    %61 = vector.extract_strided_slice %60 {offsets = [0, 0], sizes = [16, 32], strides = [1, 1]} : vector<16x64xf32> to vector<16x32xf32>
    %62 = vector.extract_strided_slice %60 {offsets = [0, 32], sizes = [16, 32], strides = [1, 1]} : vector<16x64xf32> to vector<16x32xf32>
    %63 = vector.extract_strided_slice %61 {offsets = [0, 0], sizes = [16, 16], strides = [1, 1]} : vector<16x32xf32> to vector<16x16xf32>
    %64 = vector.extract_strided_slice %61 {offsets = [0, 16], sizes = [16, 16], strides = [1, 1]} : vector<16x32xf32> to vector<16x16xf32>
    %65 = arith.mulf %61, %34 : vector<16x32xf32>
    %cst_27 = arith.constant 0.000000e+00 : f32
    %66 = vector.broadcast %cst_27 : f32 to vector<16x16xf32>
    %67 = arith.subf %66, %64 : vector<16x16xf32>
    %68 = tpu.concatenate %67, %63 in 1 : vector<16x16xf32>, vector<16x16xf32> -> vector<16x32xf32>
    %69 = arith.mulf %68, %35 : vector<16x32xf32>
    %70 = arith.addf %65, %69 : vector<16x32xf32>
    %71 = tpu.concatenate %70, %62 in 1 : vector<16x32xf32>, vector<16x32xf32> -> vector<16x64xf32>
    %72 = vector.extract_strided_slice %32 {offsets = [0, 0], sizes = [16, 64], strides = [1, 1]} : vector<16x128xf32> to vector<16x64xf32>
    %c0_28 = arith.constant 0 : index
    %c0_29 = arith.constant 0 : index
    %73 = vector.load %arg10[%c0_28, %c0_29] : memref<1x64xf32, #tpu.memory_space<vmem>>, vector<1x64xf32>
    %c0_30 = arith.constant 0 : index
    %c0_31 = arith.constant 0 : index
    %74 = vector.load %arg11[%c0_30, %c0_31] : memref<1x64xf32, #tpu.memory_space<vmem>>, vector<1x64xf32>
    %cst_32 = arith.constant dense<0.000000e+00> : vector<16xf32>
    %75 = vector.multi_reduction <add>, %72, %cst_32 [1] : vector<16x64xf32> to vector<16xf32>
    %76 = vector.shape_cast %75 : vector<16xf32> to vector<16x1xf32>
    %cst_33 = arith.constant 6.400000e+01 : f32
    %77 = vector.broadcast %cst_33 : f32 to vector<16x1xf32>
    %78 = arith.divf %76, %77 : vector<16x1xf32>
    %79 = vector.broadcast %78 : vector<16x1xf32> to vector<16x64xf32>
    %80 = arith.subf %72, %79 : vector<16x64xf32>
    %81 = arith.mulf %80, %80 : vector<16x64xf32>
    %cst_34 = arith.constant dense<0.000000e+00> : vector<16xf32>
    %82 = vector.multi_reduction <add>, %81, %cst_34 [1] : vector<16x64xf32> to vector<16xf32>
    %83 = vector.shape_cast %82 : vector<16xf32> to vector<16x1xf32>
    %cst_35 = arith.constant 6.400000e+01 : f32
    %84 = vector.broadcast %cst_35 : f32 to vector<16x1xf32>
    %85 = arith.divf %83, %84 : vector<16x1xf32>
    %86 = vector.broadcast %78 : vector<16x1xf32> to vector<16x64xf32>
    %87 = arith.subf %72, %86 : vector<16x64xf32>
    %cst_36 = arith.constant 9.99999974E-6 : f32
    %88 = vector.broadcast %cst_36 : f32 to vector<16x1xf32>
    %89 = arith.addf %85, %88 : vector<16x1xf32>
    %90 = math.rsqrt %89 : vector<16x1xf32>
    %91 = vector.broadcast %90 : vector<16x1xf32> to vector<16x64xf32>
    %92 = arith.mulf %87, %91 : vector<16x64xf32>
    %93 = vector.broadcast %73 : vector<1x64xf32> to vector<16x64xf32>
    %94 = arith.mulf %92, %93 : vector<16x64xf32>
    %95 = vector.broadcast %74 : vector<1x64xf32> to vector<16x64xf32>
    %96 = arith.addf %94, %95 : vector<16x64xf32>
    %97 = vector.extract_strided_slice %96 {offsets = [0, 0], sizes = [16, 32], strides = [1, 1]} : vector<16x64xf32> to vector<16x32xf32>
    %98 = vector.extract_strided_slice %96 {offsets = [0, 32], sizes = [16, 32], strides = [1, 1]} : vector<16x64xf32> to vector<16x32xf32>
    %99 = vector.extract_strided_slice %97 {offsets = [0, 0], sizes = [16, 16], strides = [1, 1]} : vector<16x32xf32> to vector<16x16xf32>
    %100 = vector.extract_strided_slice %97 {offsets = [0, 16], sizes = [16, 16], strides = [1, 1]} : vector<16x32xf32> to vector<16x16xf32>
    %101 = arith.mulf %97, %34 : vector<16x32xf32>
    %cst_37 = arith.constant 0.000000e+00 : f32
    %102 = vector.broadcast %cst_37 : f32 to vector<16x16xf32>
    %103 = arith.subf %102, %100 : vector<16x16xf32>
    %104 = tpu.concatenate %103, %99 in 1 : vector<16x16xf32>, vector<16x16xf32> -> vector<16x32xf32>
    %105 = arith.mulf %104, %35 : vector<16x32xf32>
    %106 = arith.addf %101, %105 : vector<16x32xf32>
    %107 = tpu.concatenate %106, %98 in 1 : vector<16x32xf32>, vector<16x32xf32> -> vector<16x64xf32>
    %108 = vector.extract_strided_slice %31 {offsets = [0, 64], sizes = [16, 64], strides = [1, 1]} : vector<16x128xf32> to vector<16x64xf32>
    %c0_38 = arith.constant 0 : index
    %c0_39 = arith.constant 0 : index
    %109 = vector.load %arg8[%c0_38, %c0_39] : memref<1x64xf32, #tpu.memory_space<vmem>>, vector<1x64xf32>
    %c0_40 = arith.constant 0 : index
    %c0_41 = arith.constant 0 : index
    %110 = vector.load %arg9[%c0_40, %c0_41] : memref<1x64xf32, #tpu.memory_space<vmem>>, vector<1x64xf32>
    %cst_42 = arith.constant dense<0.000000e+00> : vector<16xf32>
    %111 = vector.multi_reduction <add>, %108, %cst_42 [1] : vector<16x64xf32> to vector<16xf32>
    %112 = vector.shape_cast %111 : vector<16xf32> to vector<16x1xf32>
    %cst_43 = arith.constant 6.400000e+01 : f32
    %113 = vector.broadcast %cst_43 : f32 to vector<16x1xf32>
    %114 = arith.divf %112, %113 : vector<16x1xf32>
    %115 = vector.broadcast %114 : vector<16x1xf32> to vector<16x64xf32>
    %116 = arith.subf %108, %115 : vector<16x64xf32>
    %117 = arith.mulf %116, %116 : vector<16x64xf32>
    %cst_44 = arith.constant dense<0.000000e+00> : vector<16xf32>
    %118 = vector.multi_reduction <add>, %117, %cst_44 [1] : vector<16x64xf32> to vector<16xf32>
    %119 = vector.shape_cast %118 : vector<16xf32> to vector<16x1xf32>
    %cst_45 = arith.constant 6.400000e+01 : f32
    %120 = vector.broadcast %cst_45 : f32 to vector<16x1xf32>
    %121 = arith.divf %119, %120 : vector<16x1xf32>
    %122 = vector.broadcast %114 : vector<16x1xf32> to vector<16x64xf32>
    %123 = arith.subf %108, %122 : vector<16x64xf32>
    %cst_46 = arith.constant 9.99999974E-6 : f32
    %124 = vector.broadcast %cst_46 : f32 to vector<16x1xf32>
    %125 = arith.addf %121, %124 : vector<16x1xf32>
    %126 = math.rsqrt %125 : vector<16x1xf32>
    %127 = vector.broadcast %126 : vector<16x1xf32> to vector<16x64xf32>
    %128 = arith.mulf %123, %127 : vector<16x64xf32>
    %129 = vector.broadcast %109 : vector<1x64xf32> to vector<16x64xf32>
    %130 = arith.mulf %128, %129 : vector<16x64xf32>
    %131 = vector.broadcast %110 : vector<1x64xf32> to vector<16x64xf32>
    %132 = arith.addf %130, %131 : vector<16x64xf32>
    %133 = vector.extract_strided_slice %132 {offsets = [0, 0], sizes = [16, 32], strides = [1, 1]} : vector<16x64xf32> to vector<16x32xf32>
    %134 = vector.extract_strided_slice %132 {offsets = [0, 32], sizes = [16, 32], strides = [1, 1]} : vector<16x64xf32> to vector<16x32xf32>
    %135 = vector.extract_strided_slice %133 {offsets = [0, 0], sizes = [16, 16], strides = [1, 1]} : vector<16x32xf32> to vector<16x16xf32>
    %136 = vector.extract_strided_slice %133 {offsets = [0, 16], sizes = [16, 16], strides = [1, 1]} : vector<16x32xf32> to vector<16x16xf32>
    %137 = arith.mulf %133, %34 : vector<16x32xf32>
    %cst_47 = arith.constant 0.000000e+00 : f32
    %138 = vector.broadcast %cst_47 : f32 to vector<16x16xf32>
    %139 = arith.subf %138, %136 : vector<16x16xf32>
    %140 = tpu.concatenate %139, %135 in 1 : vector<16x16xf32>, vector<16x16xf32> -> vector<16x32xf32>
    %141 = arith.mulf %140, %35 : vector<16x32xf32>
    %142 = arith.addf %137, %141 : vector<16x32xf32>
    %143 = tpu.concatenate %142, %134 in 1 : vector<16x32xf32>, vector<16x32xf32> -> vector<16x64xf32>
    %144 = vector.extract_strided_slice %32 {offsets = [0, 64], sizes = [16, 64], strides = [1, 1]} : vector<16x128xf32> to vector<16x64xf32>
    %c0_48 = arith.constant 0 : index
    %c0_49 = arith.constant 0 : index
    %145 = vector.load %arg10[%c0_48, %c0_49] : memref<1x64xf32, #tpu.memory_space<vmem>>, vector<1x64xf32>
    %c0_50 = arith.constant 0 : index
    %c0_51 = arith.constant 0 : index
    %146 = vector.load %arg11[%c0_50, %c0_51] : memref<1x64xf32, #tpu.memory_space<vmem>>, vector<1x64xf32>
    %cst_52 = arith.constant dense<0.000000e+00> : vector<16xf32>
    %147 = vector.multi_reduction <add>, %144, %cst_52 [1] : vector<16x64xf32> to vector<16xf32>
    %148 = vector.shape_cast %147 : vector<16xf32> to vector<16x1xf32>
    %cst_53 = arith.constant 6.400000e+01 : f32
    %149 = vector.broadcast %cst_53 : f32 to vector<16x1xf32>
    %150 = arith.divf %148, %149 : vector<16x1xf32>
    %151 = vector.broadcast %150 : vector<16x1xf32> to vector<16x64xf32>
    %152 = arith.subf %144, %151 : vector<16x64xf32>
    %153 = arith.mulf %152, %152 : vector<16x64xf32>
    %cst_54 = arith.constant dense<0.000000e+00> : vector<16xf32>
    %154 = vector.multi_reduction <add>, %153, %cst_54 [1] : vector<16x64xf32> to vector<16xf32>
    %155 = vector.shape_cast %154 : vector<16xf32> to vector<16x1xf32>
    %cst_55 = arith.constant 6.400000e+01 : f32
    %156 = vector.broadcast %cst_55 : f32 to vector<16x1xf32>
    %157 = arith.divf %155, %156 : vector<16x1xf32>
    %158 = vector.broadcast %150 : vector<16x1xf32> to vector<16x64xf32>
    %159 = arith.subf %144, %158 : vector<16x64xf32>
    %cst_56 = arith.constant 9.99999974E-6 : f32
    %160 = vector.broadcast %cst_56 : f32 to vector<16x1xf32>
    %161 = arith.addf %157, %160 : vector<16x1xf32>
    %162 = math.rsqrt %161 : vector<16x1xf32>
    %163 = vector.broadcast %162 : vector<16x1xf32> to vector<16x64xf32>
    %164 = arith.mulf %159, %163 : vector<16x64xf32>
    %165 = vector.broadcast %145 : vector<1x64xf32> to vector<16x64xf32>
    %166 = arith.mulf %164, %165 : vector<16x64xf32>
    %167 = vector.broadcast %146 : vector<1x64xf32> to vector<16x64xf32>
    %168 = arith.addf %166, %167 : vector<16x64xf32>
    %169 = vector.extract_strided_slice %168 {offsets = [0, 0], sizes = [16, 32], strides = [1, 1]} : vector<16x64xf32> to vector<16x32xf32>
    %170 = vector.extract_strided_slice %168 {offsets = [0, 32], sizes = [16, 32], strides = [1, 1]} : vector<16x64xf32> to vector<16x32xf32>
    %171 = vector.extract_strided_slice %169 {offsets = [0, 0], sizes = [16, 16], strides = [1, 1]} : vector<16x32xf32> to vector<16x16xf32>
    %172 = vector.extract_strided_slice %169 {offsets = [0, 16], sizes = [16, 16], strides = [1, 1]} : vector<16x32xf32> to vector<16x16xf32>
    %173 = arith.mulf %169, %34 : vector<16x32xf32>
    %cst_57 = arith.constant 0.000000e+00 : f32
    %174 = vector.broadcast %cst_57 : f32 to vector<16x16xf32>
    %175 = arith.subf %174, %172 : vector<16x16xf32>
    %176 = tpu.concatenate %175, %171 in 1 : vector<16x16xf32>, vector<16x16xf32> -> vector<16x32xf32>
    %177 = arith.mulf %176, %35 : vector<16x32xf32>
    %178 = arith.addf %173, %177 : vector<16x32xf32>
    %179 = tpu.concatenate %178, %170 in 1 : vector<16x32xf32>, vector<16x32xf32> -> vector<16x64xf32>
    %180 = tpu.concatenate %71, %143 in 1 : vector<16x64xf32>, vector<16x64xf32> -> vector<16x128xf32>
    %181 = arith.truncf %180 : vector<16x128xf32> to vector<16x128xbf16>
    %c0_58 = arith.constant 0 : index
    %c0_59 = arith.constant 0 : index
    %182 = vector.load %arg12[%c0_58, %c0_59] : memref<16x128xbf16, #tpu.memory_space<vmem>>, vector<16x128xbf16>
    tpu.vector_store %arg12[%c0_58, %c0_59], %181 {strides = array<i32>} : memref<16x128xbf16, #tpu.memory_space<vmem>>, vector<16x128xbf16>,
    %183 = tpu.concatenate %107, %179 in 1 : vector<16x64xf32>, vector<16x64xf32> -> vector<16x128xf32>
    %184 = arith.truncf %183 : vector<16x128xf32> to vector<16x128xbf16>
    %c0_60 = arith.constant 0 : index
    %c0_61 = arith.constant 0 : index
    %185 = vector.load %arg13[%c0_60, %c0_61] : memref<16x128xbf16, #tpu.memory_space<vmem>>, vector<16x128xbf16>
    tpu.vector_store %arg13[%c0_60, %c0_61], %184 {strides = array<i32>} : memref<16x128xbf16, #tpu.memory_space<vmem>>, vector<16x128xbf16>,
    %186 = arith.truncf %33 : vector<16x128xf32> to vector<16x128xbf16>
    %c0_62 = arith.constant 0 : index
    %c0_63 = arith.constant 0 : index
    %187 = vector.load %arg14[%c0_62, %c0_63] : memref<16x128xbf16, #tpu.memory_space<vmem>>, vector<16x128xbf16>
    tpu.vector_store %arg14[%c0_62, %c0_63], %186 {strides = array<i32>} : memref<16x128xbf16, #tpu.memory_space<vmem>>, vector<16x128xbf16>,
    return
  }
  func.func @transform_0(%arg0: i32) -> (i32, i32) {
    %c0_i32 = arith.constant 0 : i32
    %c0_i32_0 = arith.constant 0 : i32
    return %arg0, %c0_i32 : i32, i32
  }
  func.func @transform_1(%arg0: i32) -> (i32, i32) {
    %c0_i32 = arith.constant 0 : i32
    %c0_i32_0 = arith.constant 0 : i32
    return %arg0, %c0_i32 : i32, i32
  }
  func.func @transform_2(%arg0: i32) -> (i32, i32) {
    %c0_i32 = arith.constant 0 : i32
    %c0_i32_0 = arith.constant 0 : i32
    return %arg0, %c0_i32 : i32, i32
  }
  func.func @transform_3(%arg0: i32) -> (i32, i32) {
    %c0_i32 = arith.constant 0 : i32
    %c0_i32_0 = arith.constant 0 : i32
    %c0_i32_1 = arith.constant 0 : i32
    return %c0_i32, %c0_i32_0 : i32, i32
  }
  func.func @transform_4(%arg0: i32) -> (i32, i32) {
    %c0_i32 = arith.constant 0 : i32
    %c0_i32_0 = arith.constant 0 : i32
    %c0_i32_1 = arith.constant 0 : i32
    return %c0_i32, %c0_i32_0 : i32, i32
  }
  func.func @transform_5(%arg0: i32) -> (i32, i32) {
    %c0_i32 = arith.constant 0 : i32
    %c0_i32_0 = arith.constant 0 : i32
    %c0_i32_1 = arith.constant 0 : i32
    return %c0_i32, %c0_i32_0 : i32, i32
  }
  func.func @transform_6(%arg0: i32) -> (i32, i32) {
    %c0_i32 = arith.constant 0 : i32
    %c0_i32_0 = arith.constant 0 : i32
    %c0_i32_1 = arith.constant 0 : i32
    return %c0_i32, %c0_i32_0 : i32, i32
  }
  func.func @transform_7(%arg0: i32) -> (i32, i32) {
    %c0_i32 = arith.constant 0 : i32
    %c0_i32_0 = arith.constant 0 : i32
    %c0_i32_1 = arith.constant 0 : i32
    return %c0_i32, %c0_i32_0 : i32, i32
  }
  func.func @transform_8(%arg0: i32) -> (i32, i32) {
    %c0_i32 = arith.constant 0 : i32
    %c0_i32_0 = arith.constant 0 : i32
    %c0_i32_1 = arith.constant 0 : i32
    return %c0_i32, %c0_i32_0 : i32, i32
  }
  func.func @transform_9(%arg0: i32) -> (i32, i32) {
    %c0_i32 = arith.constant 0 : i32
    %c0_i32_0 = arith.constant 0 : i32
    %c0_i32_1 = arith.constant 0 : i32
    return %c0_i32, %c0_i32_0 : i32, i32
  }
  func.func @transform_10(%arg0: i32) -> (i32, i32) {
    %c0_i32 = arith.constant 0 : i32
    %c0_i32_0 = arith.constant 0 : i32
    %c0_i32_1 = arith.constant 0 : i32
    return %c0_i32, %c0_i32_0 : i32, i32
  }
  func.func @transform_11(%arg0: i32) -> (i32, i32) {
    %c0_i32 = arith.constant 0 : i32
    %c0_i32_0 = arith.constant 0 : i32
    return %arg0, %c0_i32 : i32, i32
  }
  func.func @transform_12(%arg0: i32) -> (i32, i32) {
    %c0_i32 = arith.constant 0 : i32
    %c0_i32_0 = arith.constant 0 : i32
    return %arg0, %c0_i32 : i32, i32
  }
  func.func @transform_13(%arg0: i32) -> (i32, i32) {
    %c0_i32 = arith.constant 0 : i32
    %c0_i32_0 = arith.constant 0 : i32
    return %arg0, %c0_i32 : i32, i32
  }
}

module attributes {stable_mosaic.version = 11 : i64} {
  func.func @_post_attn_kernel(%arg0: i32, %arg1: memref<16x128xbf16, #tpu.memory_space<vmem>>, %arg2: memref<16x128xf32, #tpu.memory_space<vmem>>, %arg3: memref<128x128xbf16, #tpu.memory_space<vmem>>, %arg4: memref<1x128xf32, #tpu.memory_space<vmem>>, %arg5: memref<1x128xf32, #tpu.memory_space<vmem>>, %arg6: memref<1x128xf32, #tpu.memory_space<vmem>>, %arg7: memref<128x512xbf16, #tpu.memory_space<vmem>>, %arg8: memref<1x512xf32, #tpu.memory_space<vmem>>, %arg9: memref<512x128xbf16, #tpu.memory_space<vmem>>, %arg10: memref<1x128xf32, #tpu.memory_space<vmem>>, %arg11: memref<16x128xf32, #tpu.memory_space<vmem>>) attributes {dimension_semantics = [#tpu.dimension_semantics<parallel>], iteration_bounds = array<i64: 1>, scalar_prefetch = 0 : i64, scratch_operands = 0 : i64, tpu.core_type = #tpu.core_type<tc>, window_params = [{transform_indices = @transform_0, window_bounds = array<i64: 16, 128>}, {transform_indices = @transform_1, window_bounds = array<i64: 16, 128>}, {pipeline_mode = #tpu.pipeline_mode<synchronous>, transform_indices = @transform_2, window_bounds = array<i64: 128, 128>}, {pipeline_mode = #tpu.pipeline_mode<synchronous>, transform_indices = @transform_3, window_bounds = array<i64: 1, 128>}, {pipeline_mode = #tpu.pipeline_mode<synchronous>, transform_indices = @transform_4, window_bounds = array<i64: 1, 128>}, {pipeline_mode = #tpu.pipeline_mode<synchronous>, transform_indices = @transform_5, window_bounds = array<i64: 1, 128>}, {pipeline_mode = #tpu.pipeline_mode<synchronous>, transform_indices = @transform_6, window_bounds = array<i64: 128, 512>}, {pipeline_mode = #tpu.pipeline_mode<synchronous>, transform_indices = @transform_7, window_bounds = array<i64: 1, 512>}, {pipeline_mode = #tpu.pipeline_mode<synchronous>, transform_indices = @transform_8, window_bounds = array<i64: 512, 128>}, {pipeline_mode = #tpu.pipeline_mode<synchronous>, transform_indices = @transform_9, window_bounds = array<i64: 1, 128>}, {transform_indices = @transform_10, window_bounds = array<i64: 16, 128>}]} {
    %c0 = arith.constant 0 : index
    %c0_0 = arith.constant 0 : index
    %0 = vector.load %arg1[%c0, %c0_0] : memref<16x128xbf16, #tpu.memory_space<vmem>>, vector<16x128xbf16>
    %c0_1 = arith.constant 0 : index
    %c0_2 = arith.constant 0 : index
    %1 = vector.load %arg2[%c0_1, %c0_2] : memref<16x128xf32, #tpu.memory_space<vmem>>, vector<16x128xf32>
    %c0_3 = arith.constant 0 : index
    %c0_4 = arith.constant 0 : index
    %2 = vector.load %arg3[%c0_3, %c0_4] : memref<128x128xbf16, #tpu.memory_space<vmem>>, vector<128x128xbf16>
    %cst = arith.constant dense<0.000000e+00> : vector<16x128xf32>
    %3 = tpu.matmul %0, %2, %cst {dimension_numbers = #tpu.dot_dimension_numbers<[1], [0], [0], [1], [0, 0, 1, 1], [], []>} : vector<16x128xbf16>, vector<128x128xbf16>, vector<16x128xf32> -> vector<16x128xf32>
    %4 = arith.addf %1, %3 : vector<16x128xf32>
    %c0_5 = arith.constant 0 : index
    %c0_6 = arith.constant 0 : index
    %5 = vector.load %arg4[%c0_5, %c0_6] : memref<1x128xf32, #tpu.memory_space<vmem>>, vector<1x128xf32>
    %6 = vector.broadcast %5 : vector<1x128xf32> to vector<16x128xf32>
    %7 = arith.addf %4, %6 : vector<16x128xf32>
    %c0_7 = arith.constant 0 : index
    %c0_8 = arith.constant 0 : index
    %8 = vector.load %arg5[%c0_7, %c0_8] : memref<1x128xf32, #tpu.memory_space<vmem>>, vector<1x128xf32>
    %c0_9 = arith.constant 0 : index
    %c0_10 = arith.constant 0 : index
    %9 = vector.load %arg6[%c0_9, %c0_10] : memref<1x128xf32, #tpu.memory_space<vmem>>, vector<1x128xf32>
    %cst_11 = arith.constant dense<0.000000e+00> : vector<16xf32>
    %10 = vector.multi_reduction <add>, %7, %cst_11 [1] : vector<16x128xf32> to vector<16xf32>
    %11 = vector.shape_cast %10 : vector<16xf32> to vector<16x1xf32>
    %cst_12 = arith.constant 1.280000e+02 : f32
    %12 = vector.broadcast %cst_12 : f32 to vector<16x1xf32>
    %13 = arith.divf %11, %12 : vector<16x1xf32>
    %14 = vector.broadcast %13 : vector<16x1xf32> to vector<16x128xf32>
    %15 = arith.subf %7, %14 : vector<16x128xf32>
    %16 = arith.mulf %15, %15 : vector<16x128xf32>
    %cst_13 = arith.constant dense<0.000000e+00> : vector<16xf32>
    %17 = vector.multi_reduction <add>, %16, %cst_13 [1] : vector<16x128xf32> to vector<16xf32>
    %18 = vector.shape_cast %17 : vector<16xf32> to vector<16x1xf32>
    %cst_14 = arith.constant 1.280000e+02 : f32
    %19 = vector.broadcast %cst_14 : f32 to vector<16x1xf32>
    %20 = arith.divf %18, %19 : vector<16x1xf32>
    %21 = vector.broadcast %13 : vector<16x1xf32> to vector<16x128xf32>
    %22 = arith.subf %7, %21 : vector<16x128xf32>
    %cst_15 = arith.constant 9.99999974E-6 : f32
    %23 = vector.broadcast %cst_15 : f32 to vector<16x1xf32>
    %24 = arith.addf %20, %23 : vector<16x1xf32>
    %25 = math.rsqrt %24 : vector<16x1xf32>
    %26 = vector.broadcast %25 : vector<16x1xf32> to vector<16x128xf32>
    %27 = arith.mulf %22, %26 : vector<16x128xf32>
    %28 = vector.broadcast %8 : vector<1x128xf32> to vector<16x128xf32>
    %29 = arith.mulf %27, %28 : vector<16x128xf32>
    %30 = vector.broadcast %9 : vector<1x128xf32> to vector<16x128xf32>
    %31 = arith.addf %29, %30 : vector<16x128xf32>
    %c0_16 = arith.constant 0 : index
    %c0_17 = arith.constant 0 : index
    %32 = vector.load %arg7[%c0_16, %c0_17] : memref<128x512xbf16, #tpu.memory_space<vmem>>, vector<128x512xbf16>
    %33 = arith.truncf %31 : vector<16x128xf32> to vector<16x128xbf16>
    %cst_18 = arith.constant dense<0.000000e+00> : vector<16x512xf32>
    %34 = tpu.matmul %33, %32, %cst_18 {dimension_numbers = #tpu.dot_dimension_numbers<[1], [0], [0], [1], [0, 0, 1, 1], [], []>} : vector<16x128xbf16>, vector<128x512xbf16>, vector<16x512xf32> -> vector<16x512xf32>
    %c0_19 = arith.constant 0 : index
    %c0_20 = arith.constant 0 : index
    %35 = vector.load %arg8[%c0_19, %c0_20] : memref<1x512xf32, #tpu.memory_space<vmem>>, vector<1x512xf32>
    %36 = vector.broadcast %35 : vector<1x512xf32> to vector<16x512xf32>
    %37 = arith.addf %34, %36 : vector<16x512xf32>
    %cst_21 = arith.constant 0.000000e+00 : f32
    %38 = vector.broadcast %cst_21 : f32 to vector<16x512xf32>
    %39 = arith.maximumf %37, %38 : vector<16x512xf32>
    %40 = arith.mulf %39, %39 : vector<16x512xf32>
    %c0_22 = arith.constant 0 : index
    %c0_23 = arith.constant 0 : index
    %41 = vector.load %arg9[%c0_22, %c0_23] : memref<512x128xbf16, #tpu.memory_space<vmem>>, vector<512x128xbf16>
    %42 = arith.truncf %40 : vector<16x512xf32> to vector<16x512xbf16>
    %cst_24 = arith.constant dense<0.000000e+00> : vector<16x128xf32>
    %43 = tpu.matmul %42, %41, %cst_24 {dimension_numbers = #tpu.dot_dimension_numbers<[1], [0], [0], [1], [0, 0, 1, 1], [], []>} : vector<16x512xbf16>, vector<512x128xbf16>, vector<16x128xf32> -> vector<16x128xf32>
    %c0_25 = arith.constant 0 : index
    %c0_26 = arith.constant 0 : index
    %44 = vector.load %arg10[%c0_25, %c0_26] : memref<1x128xf32, #tpu.memory_space<vmem>>, vector<1x128xf32>
    %45 = vector.broadcast %44 : vector<1x128xf32> to vector<16x128xf32>
    %46 = arith.addf %43, %45 : vector<16x128xf32>
    %47 = arith.addf %7, %46 : vector<16x128xf32>
    %c0_27 = arith.constant 0 : index
    %c0_28 = arith.constant 0 : index
    %48 = vector.load %arg11[%c0_27, %c0_28] : memref<16x128xf32, #tpu.memory_space<vmem>>, vector<16x128xf32>
    tpu.vector_store %arg11[%c0_27, %c0_28], %47 {strides = array<i32>} : memref<16x128xf32, #tpu.memory_space<vmem>>, vector<16x128xf32>,
    return
  }
  func.func @transform_0(%arg0: i32) -> (i32, i32) {
    %c0_i32 = arith.constant 0 : i32
    %c0_i32_0 = arith.constant 0 : i32
    return %arg0, %c0_i32 : i32, i32
  }
  func.func @transform_1(%arg0: i32) -> (i32, i32) {
    %c0_i32 = arith.constant 0 : i32
    %c0_i32_0 = arith.constant 0 : i32
    return %arg0, %c0_i32 : i32, i32
  }
  func.func @transform_2(%arg0: i32) -> (i32, i32) {
    %c0_i32 = arith.constant 0 : i32
    %c0_i32_0 = arith.constant 0 : i32
    %c0_i32_1 = arith.constant 0 : i32
    return %c0_i32, %c0_i32_0 : i32, i32
  }
  func.func @transform_3(%arg0: i32) -> (i32, i32) {
    %c0_i32 = arith.constant 0 : i32
    %c0_i32_0 = arith.constant 0 : i32
    %c0_i32_1 = arith.constant 0 : i32
    return %c0_i32, %c0_i32_0 : i32, i32
  }
  func.func @transform_4(%arg0: i32) -> (i32, i32) {
    %c0_i32 = arith.constant 0 : i32
    %c0_i32_0 = arith.constant 0 : i32
    %c0_i32_1 = arith.constant 0 : i32
    return %c0_i32, %c0_i32_0 : i32, i32
  }
  func.func @transform_5(%arg0: i32) -> (i32, i32) {
    %c0_i32 = arith.constant 0 : i32
    %c0_i32_0 = arith.constant 0 : i32
    %c0_i32_1 = arith.constant 0 : i32
    return %c0_i32, %c0_i32_0 : i32, i32
  }
  func.func @transform_6(%arg0: i32) -> (i32, i32) {
    %c0_i32 = arith.constant 0 : i32
    %c0_i32_0 = arith.constant 0 : i32
    %c0_i32_1 = arith.constant 0 : i32
    return %c0_i32, %c0_i32_0 : i32, i32
  }
  func.func @transform_7(%arg0: i32) -> (i32, i32) {
    %c0_i32 = arith.constant 0 : i32
    %c0_i32_0 = arith.constant 0 : i32
    %c0_i32_1 = arith.constant 0 : i32
    return %c0_i32, %c0_i32_0 : i32, i32
  }
  func.func @transform_8(%arg0: i32) -> (i32, i32) {
    %c0_i32 = arith.constant 0 : i32
    %c0_i32_0 = arith.constant 0 : i32
    %c0_i32_1 = arith.constant 0 : i32
    return %c0_i32, %c0_i32_0 : i32, i32
  }
  func.func @transform_9(%arg0: i32) -> (i32, i32) {
    %c0_i32 = arith.constant 0 : i32
    %c0_i32_0 = arith.constant 0 : i32
    %c0_i32_1 = arith.constant 0 : i32
    return %c0_i32, %c0_i32_0 : i32, i32
  }
  func.func @transform_10(%arg0: i32) -> (i32, i32) {
    %c0_i32 = arith.constant 0 : i32
    %c0_i32_0 = arith.constant 0 : i32
    return %arg0, %c0_i32 : i32, i32
  }
}

module attributes {stable_mosaic.version = 11 : i64} {
  func.func @_layernorm_kernel(%arg0: i32, %arg1: memref<16x128xf32, #tpu.memory_space<vmem>>, %arg2: memref<1x128xf32, #tpu.memory_space<vmem>>, %arg3: memref<1x128xf32, #tpu.memory_space<vmem>>, %arg4: memref<16x128xf32, #tpu.memory_space<vmem>>) attributes {dimension_semantics = [#tpu.dimension_semantics<parallel>], iteration_bounds = array<i64: 1>, scalar_prefetch = 0 : i64, scratch_operands = 0 : i64, tpu.core_type = #tpu.core_type<tc>, window_params = [{transform_indices = @transform_0, window_bounds = array<i64: 16, 128>}, {pipeline_mode = #tpu.pipeline_mode<synchronous>, transform_indices = @transform_1, window_bounds = array<i64: 1, 128>}, {pipeline_mode = #tpu.pipeline_mode<synchronous>, transform_indices = @transform_2, window_bounds = array<i64: 1, 128>}, {transform_indices = @transform_3, window_bounds = array<i64: 16, 128>}]} {
    %c0 = arith.constant 0 : index
    %c0_0 = arith.constant 0 : index
    %0 = vector.load %arg1[%c0, %c0_0] : memref<16x128xf32, #tpu.memory_space<vmem>>, vector<16x128xf32>
    %c0_1 = arith.constant 0 : index
    %c0_2 = arith.constant 0 : index
    %1 = vector.load %arg2[%c0_1, %c0_2] : memref<1x128xf32, #tpu.memory_space<vmem>>, vector<1x128xf32>
    %c0_3 = arith.constant 0 : index
    %c0_4 = arith.constant 0 : index
    %2 = vector.load %arg3[%c0_3, %c0_4] : memref<1x128xf32, #tpu.memory_space<vmem>>, vector<1x128xf32>
    %cst = arith.constant dense<0.000000e+00> : vector<16xf32>
    %3 = vector.multi_reduction <add>, %0, %cst [1] : vector<16x128xf32> to vector<16xf32>
    %4 = vector.shape_cast %3 : vector<16xf32> to vector<16x1xf32>
    %cst_5 = arith.constant 1.280000e+02 : f32
    %5 = vector.broadcast %cst_5 : f32 to vector<16x1xf32>
    %6 = arith.divf %4, %5 : vector<16x1xf32>
    %7 = vector.broadcast %6 : vector<16x1xf32> to vector<16x128xf32>
    %8 = arith.subf %0, %7 : vector<16x128xf32>
    %9 = arith.mulf %8, %8 : vector<16x128xf32>
    %cst_6 = arith.constant dense<0.000000e+00> : vector<16xf32>
    %10 = vector.multi_reduction <add>, %9, %cst_6 [1] : vector<16x128xf32> to vector<16xf32>
    %11 = vector.shape_cast %10 : vector<16xf32> to vector<16x1xf32>
    %cst_7 = arith.constant 1.280000e+02 : f32
    %12 = vector.broadcast %cst_7 : f32 to vector<16x1xf32>
    %13 = arith.divf %11, %12 : vector<16x1xf32>
    %14 = vector.broadcast %6 : vector<16x1xf32> to vector<16x128xf32>
    %15 = arith.subf %0, %14 : vector<16x128xf32>
    %cst_8 = arith.constant 9.99999974E-6 : f32
    %16 = vector.broadcast %cst_8 : f32 to vector<16x1xf32>
    %17 = arith.addf %13, %16 : vector<16x1xf32>
    %18 = math.rsqrt %17 : vector<16x1xf32>
    %19 = vector.broadcast %18 : vector<16x1xf32> to vector<16x128xf32>
    %20 = arith.mulf %15, %19 : vector<16x128xf32>
    %21 = vector.broadcast %1 : vector<1x128xf32> to vector<16x128xf32>
    %22 = arith.mulf %20, %21 : vector<16x128xf32>
    %23 = vector.broadcast %2 : vector<1x128xf32> to vector<16x128xf32>
    %24 = arith.addf %22, %23 : vector<16x128xf32>
    %c0_9 = arith.constant 0 : index
    %c0_10 = arith.constant 0 : index
    %25 = vector.load %arg4[%c0_9, %c0_10] : memref<16x128xf32, #tpu.memory_space<vmem>>, vector<16x128xf32>
    tpu.vector_store %arg4[%c0_9, %c0_10], %24 {strides = array<i32>} : memref<16x128xf32, #tpu.memory_space<vmem>>, vector<16x128xf32>,
    return
  }
  func.func @transform_0(%arg0: i32) -> (i32, i32) {
    %c0_i32 = arith.constant 0 : i32
    %c0_i32_0 = arith.constant 0 : i32
    return %arg0, %c0_i32 : i32, i32
  }
  func.func @transform_1(%arg0: i32) -> (i32, i32) {
    %c0_i32 = arith.constant 0 : i32
    %c0_i32_0 = arith.constant 0 : i32
    %c0_i32_1 = arith.constant 0 : i32
    return %c0_i32, %c0_i32_0 : i32, i32
  }
  func.func @transform_2(%arg0: i32) -> (i32, i32) {
    %c0_i32 = arith.constant 0 : i32
    %c0_i32_0 = arith.constant 0 : i32
    %c0_i32_1 = arith.constant 0 : i32
    return %c0_i32, %c0_i32_0 : i32, i32
  }
  func.func @transform_3(%arg0: i32) -> (i32, i32) {
    %c0_i32 = arith.constant 0 : i32
    %c0_i32_0 = arith.constant 0 : i32
    return %arg0, %c0_i32 : i32, i32
  }
}

</mosaic_0001>

<bundles_post_ra>
// kernel: fuyu_forward.10
= control target key start
LH: loop header
LB: loop body
LE: loop exit
PB: predicated region body
PF: predicated region fallthrough
CT: control target
= control target key end

     0   :  { %vm42_vm0 = vcmask 523264   ;;  %v392_v0 = vmov 0.0   ;;  %vm393_vm1 = vmmov 0   ;;  %v21_v4 = vlaneseq  ;;  %s482_s1 = inlined_call_operand.vmem [shape: bf16[16,128], index: 1, kind: input, shape index: {}]   ;;  %s483_s0 = inlined_call_operand.vmem [shape: bf16[16,128], index: 0, kind: input, shape index: {}]   ;;  %s484_s2 = inlined_call_operand.vmem [shape: bf16[16,128], index: 2, kind: input, shape index: {}]   ;;  %s485_s3 = inlined_call_operand.vmem [shape: bf16[16,128], index: 3, kind: output, shape index: {}]  }
   0x1   :  { %341 = vmatprep.subr.bf16.mxu0 %v392_v0  ;;  %v373_v1 = vld [vmem:[%s482_s1] sm:$0xff]   ;;  %343 = vmatprep.mubr.msk.bf16.mxu0 %vm393_vm1, %v392_v0  ;;  %vm94_vm3 = vcmask 130048  }
   0x2   :  { %347 = vmatprep.subr.bf16.mxu1 %v392_v0  ;;  %349 = vmatprep.mubr.msk.bf16.mxu1 %vm393_vm1, %v392_v0  ;;  %v47_v2 = vsel %vm42_vm0, %v373_v1, 0  ;;  %v374_v3 = vld [vmem:[%s483_s0] sm:$0xff]   ;;  %v432_v5 = vshrl.u32 %v21_v4, 7  ;;  %v434_v6 = vand.u32 127, %v21_v4  ;;  %s394_s0 = smov 64  }
   0x3   :  { %342 = vmatpush3.bf16.xpose.msra.mxu0 %v47_v2  ;;  %v375_v28 = vld [vmem:[%s484_s2] sm:$0xff]  }
   0x4   :  { %359 = vmatprep.subr.bf16.mxu0 %v392_v0  ;;  %vm30_vm2 = vcmp.le.s32.totalorder %v434_v6, %v432_v5  ;;  %v439_v8 = vadd.s32 8, %v432_v5  ;;  %348 = vmatpush3.bf16.msra.mxu1 %v375_v28 }
   0x5   :  { %353 = vmatprep.subr.bf16.mxu1 %v392_v0 }
   0x6   :  { %vm31_vm4 = vcmp.le.s32.totalorder %v434_v6, %v439_v8 }
   0xa   :  { %344 = vmatmul.mubr.msk.bf16.vlgmr.msra.gmra.mxu0 %vm42_vm0, %v374_v3 }
   0xb   :  { %361 = vmatprep.mubr.msk.bf16.mxu0 %vm393_vm1, %v392_v0 }
  0xca   :  { %v83_v7 = vpop.f32.mrf.mxu0 }
  0xcb   :  { %v90_v9 = vmul.f32 0.125, %v83_v7 }
  0xcc   :  { %v345_v10 = vpop.f32.mrf.mxu0 }
  0xcd   :  { %v92_v11 = vsel %vm30_vm2, %v90_v9, -1e+30 }
  0xce   :  { %v86_v12 = vpop.f32.mrf.mxu0  ;;  %v95_v13 = vsel %vm94_vm3, %v92_v11, -inf }
  0xcf   :  { %v91_v14 = vmul.f32 0.125, %v86_v12  ;;  %96 = vmax.xlane.f32.xlu0 %v95_v13 }
  0xd0   :  { %v346_v15 = vpop.f32.mrf.mxu0 }
  0xd1   :  { %v93_v16 = vsel %vm31_vm4, %v91_v14, -1e+30 }
  0xd2   :  { %v98_v17 = vsel %vm94_vm3, %v93_v16, -inf }
  0xd3   :  { %99 = vmax.xlane.f32.xlu0 %v98_v17 }
  0xe9   :  { %170 = vrot.lane.b32.xlu0 %v373_v1, %s394_s0 }
 0x158   :  { %v97_v18 = vpop.xlane.xlu0 %96 }
 0x159   :  { %v101_v19 = vsub.f32 %v92_v11, %v97_v18 }
 0x15b   :  { %v103_v20 = vmul.f32 1.442695, %v101_v19 }
 0x15c   :  { %v100_v21 = vpop.xlane.xlu0 %99 }
 0x15d   :  { %376 = vpow2.f32 %v103_v20  ;;  %v102_v22 = vsub.f32 %v93_v16, %v100_v21 }
 0x15f   :  { %v105_v23 = vmul.f32 1.442695, %v102_v22 }
 0x160   :  { %v171_v33 = vpop.permute.xlu0 %170 }
 0x161   :  { %378 = vpow2.f32 %v105_v23  ;;  %v176_v36 = vsel %vm42_vm0, %v171_v33, 0 }
 0x16a   :  { %v377_v24 = vpop.eup %376 }
 0x16b   :  { %v107_v25 = vsel %vm94_vm3, %v377_v24, 0.0 }
 0x16c   :  { %108 = vadd.xlane.f32.xlu1 %v107_v25 }
 0x16e   :  { %v379_v26 = vpop.eup %378 }
 0x16f   :  { %v110_v27 = vsel %vm94_vm3, %v379_v26, 0.0 }
 0x170   :  { %111 = vadd.xlane.f32.xlu1 %v110_v27 }
 0x181   :  { %168 = vrot.lane.b32.xlu1 %v374_v3, %s394_s0 }
 0x1f5   :  { %v109_v29 = vpop.xlane.xlu1 %108 }
 0x1f6   :  { %380 = vrcp.f32 %v109_v29 }
 0x1f9   :  { %v112_v30 = vpop.xlane.xlu1 %111 }
 0x1fa   :  { %382 = vrcp.f32 %v112_v30 }
 0x1fd   :  { %v169_v38 = vpop.permute.xlu1 %168 }
 0x203   :  { %v381_v31 = vpop.eup %380 }
 0x204   :  { %v115_v34 = vmul.f32 %v381_v31, %v377_v24 }
 0x207   :  { %v383_v32 = vpop.eup %382 }
 0x208   :  { %v116_v35 = vmul.f32 %v383_v32, %v379_v26 }
 0x20a   :  { %v117_v37 = vpack.c.bf16 %v116_v35, %v115_v34 }
 0x20c   :  { %350 = vmatmul.mubr.msk.bf16.vlgmr.msra.gmra.mxu1 %vm94_vm3, %v117_v37 }
 0x20d   :  { %354 = vmatpush3.bf16.xpose.msra.mxu1 %v176_v36  ;;  %355 = vmatprep.mubr.msk.bf16.mxu1 %vm393_vm1, %v392_v0 }
 0x214   :  { %356 = vmatmul.mubr.msk.bf16.vlgmr.msra.gmra.mxu1 %vm42_vm0, %v169_v38 }
 0x2cc   :  { %v161_v39 = vpop.f32.mrf.mxu1 }
 0x2ce   :  { %v351_v40 = vpop.f32.mrf.mxu1 }
 0x2d0   :  { %v164_v41 = vpop.f32.mrf.mxu1 }
 0x2d2   :  { %v352_v42 = vpop.f32.mrf.mxu1 }
 0x2d4   :  { %v212_v43 = vpop.f32.mrf.mxu1 }
 0x2d5   :  { %v219_v44 = vmul.f32 0.125, %v212_v43 }
 0x2d6   :  { %v357_v45 = vpop.f32.mrf.mxu1 }
 0x2d7   :  { %v221_v46 = vsel %vm30_vm2, %v219_v44, -1e+30 }
 0x2d8   :  { %v215_v47 = vpop.f32.mrf.mxu1  ;;  %v223_v48 = vsel %vm94_vm3, %v221_v46, -inf }
 0x2d9   :  { %v220_v49 = vmul.f32 0.125, %v215_v47  ;;  %224 = vmax.xlane.f32.xlu1 %v223_v48 }
 0x2da   :  { %v358_v50 = vpop.f32.mrf.mxu1 }
 0x2db   :  { %v222_v51 = vsel %vm31_vm4, %v220_v49, -1e+30 }
 0x2dc   :  { %v226_v52 = vsel %vm94_vm3, %v222_v51, -inf }
 0x2dd   :  { %227 = vmax.xlane.f32.xlu0 %v226_v52 }
 0x362   :  { %v225_v53 = vpop.xlane.xlu1 %224 }
 0x363   :  { %v229_v54 = vsub.f32 %v221_v46, %v225_v53 }
 0x365   :  { %v231_v55 = vmul.f32 1.442695, %v229_v54 }
 0x366   :  { %v228_v56 = vpop.xlane.xlu0 %227 }
 0x367   :  { %384 = vpow2.f32 %v231_v55  ;;  %v230_v57 = vsub.f32 %v222_v51, %v228_v56 }
 0x369   :  { %v233_v58 = vmul.f32 1.442695, %v230_v57 }
 0x36b   :  { %386 = vpow2.f32 %v233_v58 }
 0x374   :  { %v385_v59 = vpop.eup %384 }
 0x375   :  { %v235_v60 = vsel %vm94_vm3, %v385_v59, 0.0 }
 0x376   :  { %236 = vadd.xlane.f32.xlu0 %v235_v60 }
 0x378   :  { %v387_v61 = vpop.eup %386 }
 0x379   :  { %v238_v62 = vsel %vm94_vm3, %v387_v61, 0.0 }
 0x37a   :  { %239 = vadd.xlane.f32.xlu1 %v238_v62 }
 0x38c   :  { %246 = vrot.lane.b32.xlu0 %v375_v28, %s394_s0 }
 0x3ff   :  { %v237_v63 = vpop.xlane.xlu0 %236 }
 0x400   :  { %388 = vrcp.f32 %v237_v63 }
 0x403   :  { %v240_v0 = vpop.xlane.xlu1 %239  ;;  %v247_v1 = vpop.permute.xlu0 %246 }
 0x404   :  { %390 = vrcp.f32 %v240_v0  ;;  %360 = vmatpush3.bf16.msra.mxu0 %v247_v1 }
 0x40d   :  { %v389_v2 = vpop.eup %388 }
 0x40e   :  { %v243_v4 = vmul.f32 %v389_v2, %v385_v59 }
 0x411   :  { %v391_v3 = vpop.eup %390 }
 0x412   :  { %v244_v5 = vmul.f32 %v391_v3, %v387_v61 }
 0x414   :  { %v245_v6 = vpack.c.bf16 %v244_v5, %v243_v4 }
 0x416   :  { %362 = vmatmul.mubr.msk.bf16.vlgmr.msra.gmra.mxu0 %vm94_vm3, %v245_v6 }
 0x4d6   :  { %v286_v7 = vpop.f32.mrf.mxu0 }
 0x4d8   :  { %v363_v8 = vpop.f32.mrf.mxu0 }
 0x4da   :  { %v289_v9 = vpop.f32.mrf.mxu0 }
 0x4db   :  { %v368_v10 = vpack.i.bf16 %v289_v9, %v286_v7 }
 0x4dc   :  { %v364_v11 = vpop.f32.mrf.mxu0 }
 0x4dd   :  { %369 = vrot.lane.b32.xlu1 %v368_v10, %s394_s0 }
 0x54f   :  { %v370_v12 = vpop.permute.xlu1 %369 }
 0x550   :  { %v372_v13 = vunpack.i.h.bf16 %v370_v12  ;;  %v371_v14 = vunpack.i.l.bf16 %v370_v12 }
 0x552   :  { %v302_v15 = vsel %vm42_vm0, %v164_v41, %v372_v13  ;;  %v301_v16 = vsel %vm42_vm0, %v161_v39, %v371_v14 }
 0x553   :  { %v331_v17 = vpack.c.bf16 %v302_v15, %v301_v16 }
 0x555   :  { %332 = vst [vmem:[%s485_s3] sm:$0xff] %v331_v17  }

// kernel: fuyu_forward.8
= control target key start
LH: loop header
LB: loop body
LE: loop exit
PB: predicated region body
PF: predicated region fallthrough
CT: control target
= control target key end

     0   :  { %v181_v0 = vmov 0.0   ;;  %vm182_vm0 = vmmov 0   ;;  %s236_s1 = inlined_call_operand.vmem [shape: bf16[128,128], index: 1, kind: input, shape index: {}]   ;;  %s237_s0 = inlined_call_operand.vmem [shape: f32[8,128], index: 0, kind: input, shape index: {}]   ;;  %s238_s2 = inlined_call_operand.vmem [shape: f32[1,128], index: 2, kind: input, shape index: {}]   ;;  %s239_s3 = inlined_call_operand.vmem [shape: f32[8,128], index: 3, kind: output, shape index: {}]  }
   0x1   :  { %151 = vmatprep.subr.bf16.mxu0 %v181_v0  ;;  %v173_v1 = vld [vmem:[%s236_s1 + $0x38] sm:$0xff]   ;;  %167 = vmatprep.mubr.msk.bf16.mxu0 %vm182_vm0, %v181_v0  ;;  %v174_v2 = vld [vmem:[%s236_s1 + $0x30] sm:$0xff]   ;;  %v175_v3 = vld [vmem:[%s236_s1 + $0x28] sm:$0xff]  }
   0x2   :  { %152 = vmatpush3.bf16.msra.mxu0 %v173_v1  ;;  %v176_v4 = vld [vmem:[%s236_s1 + $0x20] sm:$0xff]   ;;  %v177_v5 = vld [vmem:[%s236_s1 + $0x18] sm:$0xff]   ;;  %v178_v6 = vld [vmem:[%s236_s1 + $0x10] sm:$0xff]  }
   0x3   :  { %153 = vmatprep.subr.bf16.mxu0 %v181_v0  ;;  %v179_v7 = vld [vmem:[%s236_s1 + $0x8] sm:$0xff]   ;;  %v180_v8 = vld [vmem:[%s236_s1] sm:$0xff]  }
   0x4   :  { %v15_v9 = vld [vmem:[%s237_s0] sm:$0xff] }
   0x5   :  { %v32_v10 = vpack.c.bf16 %v15_v9, %v15_v9  ;;  %v133_v11 = vld [vmem:[%s238_s2] ss:$0 sm:$0xff] }
   0x6   :  { %154 = vmatpush3.bf16.msra.mxu0 %v174_v2 }
   0x7   :  { %155 = vmatprep.subr.bf16.mxu0 %v181_v0 }
   0xa   :  { %156 = vmatpush3.bf16.msra.mxu0 %v175_v3 }
   0xb   :  { %157 = vmatprep.subr.bf16.mxu0 %v181_v0 }
   0xe   :  { %158 = vmatpush3.bf16.msra.mxu0 %v176_v4 }
   0xf   :  { %159 = vmatprep.subr.bf16.mxu0 %v181_v0 }
  0x12   :  { %160 = vmatpush3.bf16.msra.mxu0 %v177_v5 }
  0x13   :  { %161 = vmatprep.subr.bf16.mxu0 %v181_v0 }
  0x16   :  { %162 = vmatpush3.bf16.msra.mxu0 %v178_v6 }
  0x17   :  { %163 = vmatprep.subr.bf16.mxu0 %v181_v0 }
  0x1a   :  { %164 = vmatpush3.bf16.msra.mxu0 %v179_v7 }
  0x1b   :  { %165 = vmatprep.subr.bf16.mxu0 %v181_v0 }
  0x1e   :  { %166 = vmatpush3.bf16.msra.mxu0 %v180_v8 }
  0x21   :  { %168 = vmatmul.mubr.bf16.vlgmr.msra.gmra.mxu0 %v32_v10 }
  0xe1   :  { %v122_v12 = vpop.f32.mrf.mxu0 }
  0xe2   :  { %v123_v13 = vadd.f32 %v133_v11, %v122_v12 }
  0xe3   :  { %v169_v14 = vpop.f32.mrf.mxu0 }
  0xe4   :  { %128 = vst [vmem:[%s239_s3] sm:$0xff] %v123_v13 }
  0xe5   :  { %v125_v15 = vpop.f32.mrf.mxu0 }
  0xe7   :  { %v170_v16 = vpop.f32.mrf.mxu0 }

// kernel: fuyu_forward.9
= control target key start
LH: loop header
LB: loop body
LE: loop exit
PB: predicated region body
PF: predicated region fallthrough
CT: control target
= control target key end

     0   :  { %v949_v3 = vmov 0.0   ;;  %v950_v27 = vmov 0   ;;  %vm951_vm0 = vmmov 0   ;;  %v120_v53 = vlaneseq  ;;  %s954_s15 = smov 48   ;;  %s956_s22 = smov 16   ;;  %s1371_s0 = inlined_call_operand.vmem [shape: f32[16,128], index: 0, kind: input, shape index: {}]   ;;  %s1372_s5 = inlined_call_operand.vmem [shape: bf16[128,384], index: 5, kind: input, shape index: {}]   ;;  %s1373_s3 = inlined_call_operand.vmem [shape: f32[1,128], index: 3, kind: input, shape index: {}]   ;;  %s1374_s4 = inlined_call_operand.vmem [shape: f32[1,128], index: 4, kind: input, shape index: {}]   ;;  %s1375_s6 = inlined_call_operand.vmem [shape: f32[1,384], index: 6, kind: input, shape index: {}]   ;;  %s1376_s13 = inlined_call_operand.vmem [shape: bf16[16,128], index: 13, kind: output, shape index: {2}]   ;;  %s1377_s7 = inlined_call_operand.vmem [shape: f32[1,64], index: 7, kind: input, shape index: {}]   ;;  %s1378_s9 = inlined_call_operand.vmem [shape: f32[1,64], index: 9, kind: input, shape index: {}]   ;;  %s1379_s8 = inlined_call_operand.vmem [shape: f32[1,64], index: 8, kind: input, shape index: {}]   ;;  %s1380_s10 = inlined_call_operand.vmem [shape: f32[1,64], index: 10, kind: input, shape index: {}]   ;;  %s1381_s1 = inlined_call_operand.vmem [shape: f32[16,32], index: 1, kind: input, shape index: {}]   ;;  %s1382_s2 = inlined_call_operand.vmem [shape: f32[16,32], index: 2, kind: input, shape index: {}]   ;;  %s1383_s11 = inlined_call_operand.vmem [shape: bf16[16,128], index: 11, kind: output, shape index: {0}]   ;;  %s1384_s12 = inlined_call_operand.vmem [shape: bf16[16,128], index: 12, kind: output, shape index: {1}]  }
   0x1   :  { %v42_v0 = vld [vmem:[%s1371_s0] sm:$0xff]  ;;  %v43_v1 = vld [vmem:[%s1371_s0 + $0x8] sm:$0xff]  ;;  %839 = vmatprep.subr.bf16.mxu1 %v949_v3  ;;  %v900_v5 = vld [vmem:[%s1372_s5 + $0xb0] ss:$12 sps:$4 sm:$0xff]   ;;  %295 = vmatprep.mubr.bf16.mxu0 %v950_v27  ;;  %vm353_vm1 = vcmask 523264   ;;  %vm417_vm2 = vcmask 130048  }
   0x2   :  { %46 = vadd.xlane.f32.xlu0 %v42_v0  ;;  %v897_v2 = vld [vmem:[%s1372_s5 + $0xac] ss:$12 sps:$4 sm:$0xff]   ;;  %v899_v4 = vld [vmem:[%s1372_s5 + $0xa8] ss:$12 sps:$4 sm:$0xff]   ;;  %840 = vmatpush3.bf16.msra.mxu1 %v900_v5  ;;  %v903_v15 = vld [vmem:[%s1372_s5 + $0x90] ss:$12 sps:$4 sm:$0xff]  }
   0x3   :  { %263 = vmatprep.subr.bf16.mxu0 %v897_v2  ;;  %841 = vmatprep.subr.bf16.mxu1 %v949_v3  ;;  %v901_v14 = vld [vmem:[%s1372_s5 + $0x94] ss:$12 sps:$4 sm:$0xff]   ;;  %v904_v16 = vld [vmem:[%s1372_s5 + $0x98] ss:$12 sps:$4 sm:$0xff]   ;;  %v905_v17 = vld [vmem:[%s1372_s5 + $0x7c] ss:$12 sps:$4 sm:$0xff]  }
   0x4   :  { %264 = vmatpush1.bf16.msra.mxu0 %v899_v4  ;;  %v907_v18 = vld [vmem:[%s1372_s5 + $0x78] ss:$12 sps:$4 sm:$0xff]   ;;  %v908_v19 = vld [vmem:[%s1372_s5 + $0x80] ss:$12 sps:$4 sm:$0xff]   ;;  %v912_v22 = vld [vmem:[%s1372_s5 + $0x68] ss:$12 sps:$4 sm:$0xff]   ;;  %855 = vmatprep.mubr.msk.bf16.mxu1 %vm951_vm0, %v949_v3 }
   0x5   :  { %265 = vmatprep.subr.bf16.mxu0 %v901_v14  ;;  %v909_v20 = vld [vmem:[%s1372_s5 + $0x64] ss:$12 sps:$4 sm:$0xff]   ;;  %v911_v21 = vld [vmem:[%s1372_s5 + $0x60] ss:$12 sps:$4 sm:$0xff]   ;;  %v915_v24 = vld [vmem:[%s1372_s5 + $0x48] ss:$12 sps:$4 sm:$0xff]  }
   0x6   :  { %48 = vadd.xlane.f32.xlu0 %v43_v1  ;;  %842 = vmatpush3.bf16.msra.mxu1 %v904_v16  ;;  %v913_v23 = vld [vmem:[%s1372_s5 + $0x4c] ss:$12 sps:$4 sm:$0xff]   ;;  %v916_v25 = vld [vmem:[%s1372_s5 + $0x50] ss:$12 sps:$4 sm:$0xff]   ;;  %v917_v26 = vld [vmem:[%s1372_s5 + $0x34] ss:$12 sps:$4 sm:$0xff]  }
   0x7   :  { %843 = vmatprep.subr.bf16.mxu1 %v949_v3  ;;  %v919_v28 = vld [vmem:[%s1372_s5 + $0x30] ss:$12 sps:$4 sm:$0xff]   ;;  %v920_v29 = vld [vmem:[%s1372_s5 + $0x38] ss:$12 sps:$4 sm:$0xff]   ;;  %v924_v32 = vld [vmem:[%s1372_s5 + $0x20] ss:$12 sps:$4 sm:$0xff]  }
   0x8   :  { %266 = vmatpush1.bf16.msra.mxu0 %v903_v15  ;;  %v921_v30 = vld [vmem:[%s1372_s5 + $0x1c] ss:$12 sps:$4 sm:$0xff]   ;;  %v923_v31 = vld [vmem:[%s1372_s5 + $0x18] ss:$12 sps:$4 sm:$0xff]   ;;  %v927_v34 = vld [vmem:[%s1372_s5] ss:$12 sps:$4 sm:$0xff]  }
   0x9   :  { %267 = vmatprep.subr.bf16.mxu0 %v905_v17  ;;  %v925_v33 = vld [vmem:[%s1372_s5 + $0x4] ss:$12 sps:$4 sm:$0xff]   ;;  %v928_v35 = vld [vmem:[%s1372_s5 + $0x8] ss:$12 sps:$4 sm:$0xff]   ;;  %v773_v44 = vld [vmem:[%s1373_s3] ss:$0 sm:$0xff] }
   0xa   :  { %844 = vmatpush3.bf16.msra.mxu1 %v908_v19  ;;  %v774_v48 = vld [vmem:[%s1374_s4] ss:$0 sm:$0xff]  ;;  %v121_v54 = vshrl.u32 %v120_v53, 7  ;;  %s952_s3 = smov 64   ;;  %vm424_vm3 = vcmask 261120  }
   0xb   :  { %845 = vmatprep.subr.bf16.mxu1 %v949_v3  ;;  %v118_v56 = vld [vmem:[%s1375_s6] sm:$0x7] }
   0xc   :  { %268 = vmatpush1.bf16.msra.mxu0 %v907_v18  ;;  %v122_v55 = vsub.s32 0, %v121_v54  ;;  %v126_v57 = vsub.s32 1, %v121_v54  ;;  %v130_v59 = vsub.s32 2, %v121_v54 }
   0xd   :  { %269 = vmatprep.subr.bf16.mxu0 %v909_v20 }
   0xe   :  { %846 = vmatpush3.bf16.msra.mxu1 %v912_v22  ;;  %v123_v58 = vrot.slane %v118_v56, %v122_v55  ;;  %v127_v60 = vrot.slane %v118_v56, %v126_v57 }
   0xf   :  { %847 = vmatprep.subr.bf16.mxu1 %v949_v3 }
  0x10   :  { %270 = vmatpush1.bf16.msra.mxu0 %v911_v21 }
  0x11   :  { %271 = vmatprep.subr.bf16.mxu0 %v913_v23 }
  0x12   :  { %848 = vmatpush3.bf16.msra.mxu1 %v916_v25 }
  0x13   :  { %849 = vmatprep.subr.bf16.mxu1 %v949_v3 }
  0x14   :  { %272 = vmatpush1.bf16.msra.mxu0 %v915_v24 }
  0x15   :  { %273 = vmatprep.subr.bf16.mxu0 %v917_v26 }
  0x16   :  { %850 = vmatpush3.bf16.msra.mxu1 %v920_v29 }
  0x17   :  { %851 = vmatprep.subr.bf16.mxu1 %v949_v3 }
  0x18   :  { %274 = vmatpush1.bf16.msra.mxu0 %v919_v28 }
  0x19   :  { %275 = vmatprep.subr.bf16.mxu0 %v921_v30  ;;  %v1168_v30 = vld [vmem:[%s1377_s7] ss:$0 sm:$0xff] }
  0x1a   :  { %852 = vmatpush3.bf16.msra.mxu1 %v924_v32 }
  0x1b   :  { %853 = vmatprep.subr.bf16.mxu1 %v949_v3 }
  0x1c   :  { %276 = vmatpush1.bf16.msra.mxu0 %v923_v31 }
  0x1d   :  { %277 = vmatprep.subr.bf16.mxu0 %v925_v33 }
  0x1e   :  { %854 = vmatpush3.bf16.msra.mxu1 %v928_v35 }
  0x20   :  { %278 = vmatpush1.bf16.msra.mxu0 %v927_v34 }
  0x8b   :  { %v47_v6 = vpop.xlane.xlu0 %46 }
  0x8c   :  { %v51_v7 = vmul.f32 0.0078125, %v47_v6 }
  0x8e   :  { %v1044_v8 = vsub.f32 %v42_v0, %v51_v7  ;;  %v131_v0 = vrot.slane %v118_v56, %v130_v59 }
  0x8f   :  { %v49_v9 = vpop.xlane.xlu0 %48 }
  0x90   :  { %v52_v10 = vmul.f32 0.0078125, %v49_v9  ;;  %v55_v11 = vmul.f32 %v1044_v8, %v1044_v8 }
  0x92   :  { %v1048_v12 = vsub.f32 %v43_v1, %v52_v10  ;;  %57 = vadd.xlane.f32.xlu1 %v55_v11 }
  0x94   :  { %v56_v13 = vmul.f32 %v1048_v12, %v1048_v12 }
  0x96   :  { %59 = vadd.xlane.f32.xlu1 %v56_v13 }
 0x11b   :  { %v58_v36 = vpop.xlane.xlu1 %57 }
 0x11c   :  { %v61_v37 = vmul.f32 0.0078125, %v58_v36 }
 0x11e   :  { %v63_v38 = vadd.f32 1e-05, %v61_v37 }
 0x11f   :  { %v60_v39 = vpop.xlane.xlu1 %59 }
 0x120   :  { %929 = vrsqrt.f32 %v63_v38  ;;  %v62_v40 = vmul.f32 0.0078125, %v60_v39  ;;  %v1190_v38 = vld [vmem:[%s1378_s9] ss:$0 sm:$0xff] }
 0x121   :  { %v1197_v39 = vld [vmem:[%s1379_s8] ss:$0 sm:$0xff] }
 0x122   :  { %v64_v41 = vadd.f32 1e-05, %v62_v40 }
 0x124   :  { %931 = vrsqrt.f32 %v64_v41 }
 0x12d   :  { %v930_v42 = vpop.eup %929 }
 0x12e   :  { %v67_v43 = vmul.f32 %v930_v42, %v1044_v8 }
 0x130   :  { %v75_v47 = vmul.f32 %v773_v44, %v67_v43 }
 0x131   :  { %v932_v45 = vpop.eup %931 }
 0x132   :  { %v68_v46 = vmul.f32 %v932_v45, %v1048_v12  ;;  %v83_v50 = vadd.f32 %v774_v48, %v75_v47 }
 0x134   :  { %v76_v49 = vmul.f32 %v773_v44, %v68_v46 }
 0x136   :  { %v84_v51 = vadd.f32 %v774_v48, %v76_v49  ;;  %v1210_v49 = vld [vmem:[%s1380_s10] ss:$0 sm:$0xff]  ;;  %s953_s10 = smov 80  }
 0x138   :  { %v117_v52 = vpack.c.bf16 %v84_v51, %v83_v50 }
 0x13a   :  { %296 = vmatmul.mubr.bf16.vlgmr.msra.gmra.mxu0 %v117_v52  ;;  %856 = vmatmul.mubr.bf16.vlgmr.msra.gmra.mxu1 %v117_v52 }
 0x1fa   :  { %v297_v61 = vpop.f32.mrf.mxu0  ;;  %v340_v62 = vpop.f32.mrf.mxu1 }
 0x1fb   :  { %v1133_v63 = vadd.f32 %v297_v61, %v123_v58  ;;  %v341_v6 = vadd.f32 %v340_v62, %v131_v0 }
 0x1fc   :  { %v299_v1 = vpop.f32.mrf.mxu0  ;;  %v857_v2 = vpop.f32.mrf.mxu1 }
 0x1fd   :  { %v1135_v3 = vadd.f32 %v299_v1, %v127_v60  ;;  %501 = vrot.lane.b32.xlu0 %v1133_v63, %s952_s3  ;;  %v354_v46 = vsel %vm353_vm1, %v1133_v63, 0.0 }
 0x1fe   :  { %v301_v4 = vpop.f32.mrf.mxu0  ;;  %v343_v5 = vpop.f32.mrf.mxu1 }
 0x1ff   :  { %v344_v7 = vadd.f32 %v343_v5, %v131_v0  ;;  %611 = vrot.lane.b32.xlu1 %v1135_v3, %s952_s3  ;;  %v1141_v9 = vadd.f32 %v301_v4, %v123_v58 }
 0x200   :  { %v858_v8 = vpop.f32.mrf.mxu1  ;;  %v303_v11 = vpop.f32.mrf.mxu0 }
 0x201   :  { %v828_v10 = vpack.c.bf16 %v344_v7, %v341_v6  ;;  %v1148_v12 = vadd.f32 %v303_v11, %v127_v60 }
 0x203   :  { %829 = vst [vmem:[%s1376_s13] sm:$0xff] %v828_v10   ;;  %503 = vrot.lane.b32.xlu1 %v1141_v9, %s952_s3 }
 0x207   :  { %613 = vrot.lane.b32.xlu1 %v1148_v12, %s952_s3 }
 0x26f   :  { %v502_v13 = vpop.permute.xlu0 %501 }
 0x270   :  { %v507_v14 = vsel %vm353_vm1, %v502_v13, 0.0 }
 0x271   :  { %v612_v15 = vpop.permute.xlu1 %611  ;;  %508 = vadd.xlane.f32.xlu0 %v507_v14 }
 0x272   :  { %v617_v16 = vsel %vm353_vm1, %v612_v15, 0.0 }
 0x275   :  { %v504_v17 = vpop.permute.xlu1 %503  ;;  %618 = vadd.xlane.f32.xlu0 %v617_v16 }
 0x276   :  { %v510_v18 = vsel %vm353_vm1, %v504_v17, 0.0 }
 0x277   :  { %511 = vadd.xlane.f32.xlu1 %v510_v18 }
 0x279   :  { %v614_v19 = vpop.permute.xlu1 %613 }
 0x27a   :  { %v620_v20 = vsel %vm353_vm1, %v614_v19, 0.0 }
 0x27b   :  { %621 = vadd.xlane.f32.xlu0 %v620_v20 }
 0x2fa   :  { %v509_v21 = vpop.xlane.xlu0 %508 }
 0x2fb   :  { %v513_v22 = vmul.f32 0.015625, %v509_v21 }
 0x2fd   :  { %v1157_v23 = vsub.f32 %v1133_v63, %v513_v22 }
 0x2fe   :  { %v619_v24 = vpop.xlane.xlu0 %618 }
 0x2ff   :  { %v623_v25 = vmul.f32 0.015625, %v619_v24  ;;  %v517_v26 = vmul.f32 %v1157_v23, %v1157_v23 }
 0x300   :  { %v512_v27 = vpop.xlane.xlu1 %511 }
 0x301   :  { %v1162_v28 = vsub.f32 %v1135_v3, %v623_v25  ;;  %v514_v29 = vmul.f32 0.015625, %v512_v27  ;;  %521 = vrot.lane.b32.xlu0 %v517_v26, %s952_s3  ;;  %v429_v27 = vsel %vm353_vm1, %v1135_v3, 0.0 }
 0x303   :  { %v1171_v31 = vsub.f32 %v1141_v9, %v514_v29  ;;  %v627_v32 = vmul.f32 %v1162_v28, %v1162_v28  ;;  %v357_v29 = vsel %vm353_vm1, %v1141_v9, 0.0 }
 0x304   :  { %v622_v33 = vpop.xlane.xlu0 %621 }
 0x305   :  { %v624_v34 = vmul.f32 0.015625, %v622_v33  ;;  %631 = vrot.lane.b32.xlu1 %v627_v32, %s952_s3  ;;  %541 = vrot.lane.b32.xlu0 %v1168_v30, %s952_s3  ;;  %v518_v36 = vmul.f32 %v1171_v31, %v1171_v31  ;;  %v1250_v32 = vld [vmem:[%s1381_s1 + $0x8] sm:$0xff] }
 0x307   :  { %v1179_v35 = vsub.f32 %v1148_v12, %v624_v34 }
 0x309   :  { %523 = vrot.lane.b32.xlu1 %v518_v36, %s952_s3  ;;  %v628_v37 = vmul.f32 %v1179_v35, %v1179_v35 }
 0x30d   :  { %633 = vrot.lane.b32.xlu1 %v628_v37, %s952_s3 }
 0x311   :  { %651 = vrot.lane.b32.xlu1 %v1190_v38, %s952_s3 }
 0x315   :  { %546 = vrot.lane.b32.xlu1 %v1197_v39, %s952_s3 }
 0x373   :  { %v522_v40 = vpop.permute.xlu0 %521 }
 0x374   :  { %v527_v41 = vsel %vm353_vm1, %v522_v40, 0.0  ;;  %v1263_v40 = vld [vmem:[%s1382_s2] sm:$0xff] }
 0x375   :  { %528 = vadd.xlane.f32.xlu0 %v527_v41 }
 0x377   :  { %v632_v42 = vpop.permute.xlu1 %631  ;;  %v542_v50 = vpop.permute.xlu0 %541 }
 0x378   :  { %v637_v43 = vsel %vm353_vm1, %v632_v42, 0.0 }
 0x379   :  { %638 = vadd.xlane.f32.xlu0 %v637_v43 }
 0x37b   :  { %v524_v44 = vpop.permute.xlu1 %523 }
 0x37c   :  { %v530_v45 = vsel %vm353_vm1, %v524_v44, 0.0 }
 0x37d   :  { %531 = vadd.xlane.f32.xlu1 %v530_v45  ;;  %355 = vadd.xlane.f32.xlu0 %v354_v46  ;;  %v1271_v45 = vld [vmem:[%s1382_s2 + $0x8] sm:$0xff]  ;;  %s955_s2 = smov 112  }
 0x37f   :  { %v634_v47 = vpop.permute.xlu1 %633 }
 0x380   :  { %v640_v48 = vsel %vm353_vm1, %v634_v47, 0.0 }
 0x381   :  { %641 = vadd.xlane.f32.xlu0 %v640_v48 }
 0x383   :  { %v652_v51 = vpop.permute.xlu1 %651 }
 0x387   :  { %v547_v55 = vpop.permute.xlu1 %546 }
 0x38e   :  { %656 = vrot.lane.b32.xlu1 %v1210_v49, %s952_s3 }
 0x3fe   :  { %v529_v52 = vpop.xlane.xlu0 %528 }
 0x3ff   :  { %v533_v53 = vmul.f32 0.015625, %v529_v52 }
 0x401   :  { %v535_v54 = vadd.f32 1e-05, %v533_v53 }
 0x402   :  { %v639_v56 = vpop.xlane.xlu0 %638 }
 0x403   :  { %933 = vrsqrt.f32 %v535_v54  ;;  %v643_v57 = vmul.f32 0.015625, %v639_v56 }
 0x405   :  { %v645_v58 = vadd.f32 1e-05, %v643_v57 }
 0x406   :  { %v532_v59 = vpop.xlane.xlu1 %531  ;;  %v356_v60 = vpop.xlane.xlu0 %355 }
 0x407   :  { %935 = vrsqrt.f32 %v645_v58  ;;  %v534_v61 = vmul.f32 0.015625, %v532_v59  ;;  %v361_v33 = vmul.f32 0.015625, %v356_v60 }
 0x409   :  { %v536_v62 = vadd.f32 1e-05, %v534_v61  ;;  %v1255_v34 = vsub.f32 %v1133_v63, %v361_v33 }
 0x40a   :  { %v642_v0 = vpop.xlane.xlu0 %641  ;;  %v657_v16 = vpop.permute.xlu1 %656 }
 0x40b   :  { %937 = vrsqrt.f32 %v536_v62  ;;  %v644_v1 = vmul.f32 0.015625, %v642_v0 }
 0x40d   :  { %v646_v2 = vadd.f32 1e-05, %v644_v1 }
 0x40f   :  { %939 = vrsqrt.f32 %v646_v2 }
 0x410   :  { %v934_v4 = vpop.eup %933 }
 0x411   :  { %v539_v5 = vmul.f32 %v934_v4, %v1157_v23 }
 0x413   :  { %v544_v6 = vmul.f32 %v542_v50, %v539_v5 }
 0x414   :  { %v936_v7 = vpop.eup %935 }
 0x415   :  { %v1215_v8 = vadd.f32 %v547_v55, %v544_v6  ;;  %v649_v10 = vmul.f32 %v936_v7, %v1162_v28  ;;  %v432_v28 = vsel %vm353_vm1, %v1148_v12, 0.0 }
 0x417   :  { %573 = vrot.lane.b32.xlu0 %v1215_v8, %s953_s10  ;;  %v654_v13 = vmul.f32 %v652_v51, %v649_v10  ;;  %v561_v14 = vsub.f32 0.0, %v1215_v8 }
 0x418   :  { %v938_v11 = vpop.eup %937 }
 0x419   :  { %v540_v15 = vmul.f32 %v938_v11, %v1171_v31  ;;  %v1222_v20 = vadd.f32 %v657_v16, %v654_v13  ;;  %v1243_v31 = vld [vmem:[%s1381_s1] sm:$0xff] }
 0x41b   :  { %565 = vrot.lane.b32.xlu0 %v561_v14, %s954_s15  ;;  %v545_v17 = vmul.f32 %v542_v50, %v540_v15  ;;  %v663_v24 = vsub.f32 0.0, %v1222_v20 }
 0x41c   :  { %v940_v18 = vpop.eup %939 }
 0x41d   :  { %v650_v19 = vmul.f32 %v940_v18, %v1179_v35  ;;  %v1224_v21 = vadd.f32 %v547_v55, %v545_v17  ;;  %v365_v35 = vmul.f32 %v1255_v34, %v1255_v34 }
 0x41f   :  { %575 = vrot.lane.b32.xlu1 %v1224_v21, %s953_s10  ;;  %675 = vrot.lane.b32.xlu0 %v1222_v20, %s953_s10  ;;  %v655_v22 = vmul.f32 %v652_v51, %v650_v19  ;;  %v562_v23 = vsub.f32 0.0, %v1224_v21  ;;  %v367_v36 = vsel %vm353_vm1, %v365_v35, 0.0 }
 0x421   :  { %v1230_v25 = vadd.f32 %v657_v16, %v655_v22 }
 0x423   :  { %567 = vrot.lane.b32.xlu1 %v562_v23, %s954_s15  ;;  %667 = vrot.lane.b32.xlu0 %v663_v24, %s954_s15  ;;  %v664_v26 = vsub.f32 0.0, %v1230_v25 }
 0x427   :  { %677 = vrot.lane.b32.xlu1 %v1230_v25, %s953_s10 }
 0x42b   :  { %669 = vrot.lane.b32.xlu1 %v664_v26, %s954_s15 }
 0x442   :  { %430 = vadd.xlane.f32.xlu0 %v429_v27 }
 0x446   :  { %433 = vadd.xlane.f32.xlu0 %v432_v28 }
 0x44f   :  { %358 = vadd.xlane.f32.xlu1 %v357_v29 }
 0x45c   :  { %553 = vrot.lane.b32.xlu0 %v1243_v31, %s952_s3 }
 0x460   :  { %555 = vrot.lane.b32.xlu1 %v1250_v32, %s952_s3 }
 0x47b   :  { %368 = vadd.xlane.f32.xlu0 %v367_v36 }
 0x489   :  { %v574_v37 = vpop.permute.xlu0 %573 }
 0x48d   :  { %v566_v41 = vpop.permute.xlu0 %565 }
 0x48e   :  { %v579_v42 = vsel %vm417_vm2, %v566_v41, %v574_v37  ;;  %v882_v41 = vpack.i.bf16 %v1230_v25, %v1222_v20 }
 0x48f   :  { %v581_v43 = vmul.f32 %v579_v42, %v1263_v40 }
 0x491   :  { %v576_v63 = vpop.permute.xlu1 %575  ;;  %585 = vrot.lane.b32.xlu1 %v581_v43, %s952_s3  ;;  %v676_v44 = vpop.permute.xlu0 %675 }
 0x495   :  { %v568_v46 = vpop.permute.xlu1 %567  ;;  %v668_v47 = vpop.permute.xlu0 %667 }
 0x496   :  { %v580_v48 = vsel %vm417_vm2, %v568_v46, %v576_v63  ;;  %v681_v50 = vsel %vm417_vm2, %v668_v47, %v676_v44 }
 0x497   :  { %v582_v51 = vmul.f32 %v580_v48, %v1271_v45  ;;  %v683_v52 = vmul.f32 %v681_v50, %v1263_v40 }
 0x499   :  { %v678_v53 = vpop.permute.xlu1 %677  ;;  %587 = vrot.lane.b32.xlu1 %v582_v51, %s952_s3  ;;  %687 = vrot.lane.b32.xlu0 %v683_v52, %s952_s3 }
 0x49d   :  { %v670_v54 = vpop.permute.xlu1 %669 }
 0x49e   :  { %v682_v55 = vsel %vm417_vm2, %v670_v54, %v678_v53 }
 0x49f   :  { %v684_v56 = vmul.f32 %v682_v55, %v1271_v45 }
 0x4a1   :  { %689 = vrot.lane.b32.xlu1 %v684_v56, %s952_s3 }
 0x4cb   :  { %v431_v57 = vpop.xlane.xlu0 %430 }
 0x4cc   :  { %v435_v58 = vmul.f32 0.015625, %v431_v57 }
 0x4ce   :  { %v1283_v59 = vsub.f32 %v1135_v3, %v435_v58 }
 0x4cf   :  { %v434_v60 = vpop.xlane.xlu0 %433 }
 0x4d0   :  { %v436_v61 = vmul.f32 0.015625, %v434_v60  ;;  %v439_v62 = vmul.f32 %v1283_v59, %v1283_v59 }
 0x4d2   :  { %v1288_v0 = vsub.f32 %v1148_v12, %v436_v61  ;;  %v441_v1 = vsel %vm353_vm1, %v439_v62, 0.0  ;;  %v872_v12 = vpack.i.bf16 %v1224_v21, %v1215_v8 }
 0x4d3   :  { %442 = vadd.xlane.f32.xlu0 %v441_v1  ;;  %v554_v11 = vpop.permute.xlu0 %553 }
 0x4d4   :  { %v440_v2 = vmul.f32 %v1288_v0, %v1288_v0  ;;  %v559_v18 = vmul.f32 %v554_v11, %v1215_v8  ;;  %v661_v27 = vmul.f32 %v1222_v20, %v554_v11 }
 0x4d6   :  { %v444_v4 = vsel %vm353_vm1, %v440_v2, 0.0 }
 0x4d7   :  { %445 = vadd.xlane.f32.xlu0 %v444_v4 }
 0x4d8   :  { %v359_v5 = vpop.xlane.xlu1 %358 }
 0x4d9   :  { %v362_v3 = vmul.f32 0.015625, %v359_v5 }
 0x4db   :  { %v364_v6 = vsub.f32 %v1141_v9, %v362_v3 }
 0x4dc   :  { %v556_v13 = vpop.permute.xlu1 %555 }
 0x4dd   :  { %v366_v7 = vmul.f32 %v364_v6, %v364_v6  ;;  %v560_v9 = vmul.f32 %v556_v13, %v1224_v21  ;;  %v662_v28 = vmul.f32 %v1230_v25, %v556_v13 }
 0x4df   :  { %v370_v10 = vsel %vm353_vm1, %v366_v7, 0.0 }
 0x4e0   :  { %371 = vadd.xlane.f32.xlu1 %v370_v10 }
 0x4f1   :  { %873 = vrot.lane.b32.xlu1 %v872_v12, %s952_s3 }
 0x503   :  { %v586_v16 = vpop.permute.xlu1 %585 }
 0x504   :  { %v369_v14 = vpop.xlane.xlu0 %368  ;;  %v591_v22 = vadd.f32 %v586_v16, %v559_v18 }
 0x505   :  { %v373_v15 = vmul.f32 0.015625, %v369_v14 }
 0x507   :  { %v375_v17 = vadd.f32 1e-05, %v373_v15 }
 0x509   :  { %941 = vrsqrt.f32 %v375_v17 }
 0x50b   :  { %v588_v19 = vpop.permute.xlu1 %587  ;;  %v688_v26 = vpop.permute.xlu0 %687 }
 0x50c   :  { %v592_v23 = vadd.f32 %v588_v19, %v560_v9  ;;  %v693_v33 = vadd.f32 %v688_v26, %v661_v27 }
 0x50e   :  { %v867_v24 = vpack.i.bf16 %v592_v23, %v591_v22 }
 0x510   :  { %868 = vrot.lane.b32.xlu0 %v867_v24, %s952_s3 }
 0x513   :  { %v690_v29 = vpop.permute.xlu1 %689 }
 0x514   :  { %v694_v35 = vadd.f32 %v690_v29, %v662_v28 }
 0x516   :  { %v942_v36 = vpop.eup %941  ;;  %v877_v37 = vpack.i.bf16 %v694_v35, %v693_v33 }
 0x517   :  { %v379_v8 = vmul.f32 %v942_v36, %v1255_v34 }
 0x518   :  { %878 = vrot.lane.b32.xlu1 %v877_v37, %s952_s3 }
 0x519   :  { %v387_v21 = vmul.f32 %v1168_v30, %v379_v8 }
 0x51b   :  { %v1310_v42 = vadd.f32 %v1197_v39, %v387_v21 }
 0x51c   :  { %883 = vrot.lane.b32.xlu1 %v882_v41, %s952_s3 }
 0x51d   :  { %v399_v43 = vsub.f32 0.0, %v1310_v42  ;;  %v397_v28 = vmul.f32 %v1310_v42, %v1243_v31 }
 0x51f   :  { %403 = vrot.lane.b32.xlu0 %v399_v43, %s955_s2 }
 0x523   :  { %411 = vrot.lane.b32.xlu0 %v1310_v42, %s956_s22 }
 0x55c   :  { %v443_v34 = vpop.xlane.xlu0 %442 }
 0x55d   :  { %v447_v63 = vmul.f32 0.015625, %v443_v34 }
 0x55f   :  { %v449_v44 = vadd.f32 1e-05, %v447_v63 }
 0x560   :  { %v446_v46 = vpop.xlane.xlu0 %445 }
 0x561   :  { %943 = vrsqrt.f32 %v449_v44  ;;  %v448_v20 = vmul.f32 0.015625, %v446_v46 }
 0x563   :  { %v450_v25 = vadd.f32 1e-05, %v448_v20 }
 0x565   :  { %945 = vrsqrt.f32 %v450_v25 }
 0x569   :  { %v372_v47 = vpop.xlane.xlu1 %371 }
 0x56a   :  { %v374_v48 = vmul.f32 0.015625, %v372_v47 }
 0x56c   :  { %v376_v50 = vadd.f32 1e-05, %v374_v48 }
 0x56e   :  { %v944_v51 = vpop.eup %943  ;;  %947 = vrsqrt.f32 %v376_v50 }
 0x56f   :  { %v453_v52 = vmul.f32 %v944_v51, %v1283_v59  ;;  %v874_v59 = vpop.permute.xlu1 %873 }
 0x570   :  { %v876_v5 = vunpack.i.h.bf16 %v874_v59  ;;  %v875_v3 = vunpack.i.l.bf16 %v874_v59 }
 0x571   :  { %v461_v53 = vmul.f32 %v1190_v38, %v453_v52 }
 0x572   :  { %v946_v56 = vpop.eup %945 }
 0x573   :  { %v1320_v54 = vadd.f32 %v1210_v49, %v461_v53  ;;  %v454_v60 = vmul.f32 %v946_v56, %v1288_v0 }
 0x575   :  { %v473_v55 = vsub.f32 0.0, %v1320_v54  ;;  %v462_v4 = vmul.f32 %v1190_v38, %v454_v60  ;;  %v471_v48 = vmul.f32 %v1320_v54, %v1243_v31 }
 0x577   :  { %477 = vrot.lane.b32.xlu0 %v473_v55, %s955_s2 }
 0x57b   :  { %v948_v57 = vpop.eup %947  ;;  %485 = vrot.lane.b32.xlu0 %v1320_v54, %s956_s22 }
 0x57c   :  { %v380_v58 = vmul.f32 %v948_v57, %v364_v6 }
 0x57e   :  { %v388_v61 = vmul.f32 %v1168_v30, %v380_v58  ;;  %v470_v30 = vadd.f32 %v1210_v49, %v462_v4 }
 0x580   :  { %v396_v62 = vadd.f32 %v1197_v39, %v388_v61  ;;  %v474_v11 = vsub.f32 0.0, %v470_v30 }
 0x582   :  { %v869_v1 = vpop.permute.xlu0 %868  ;;  %v400_v2 = vsub.f32 0.0, %v396_v62  ;;  %v398_v37 = vmul.f32 %v396_v62, %v1250_v32 }
 0x583   :  { %v871_v7 = vunpack.i.h.bf16 %v869_v1  ;;  %v870_v10 = vunpack.i.l.bf16 %v869_v1 }
 0x584   :  { %405 = vrot.lane.b32.xlu1 %v400_v2, %s955_s2 }
 0x585   :  { %v607_v6 = vsel %vm424_vm3, %v870_v10, %v875_v3  ;;  %v608_v0 = vsel %vm424_vm3, %v871_v7, %v876_v5 }
 0x586   :  { %v887_v12 = vpack.i.bf16 %v608_v0, %v607_v6 }
 0x588   :  { %413 = vrot.lane.b32.xlu1 %v396_v62, %s956_s22  ;;  %888 = vrot.lane.b32.xlu0 %v887_v12, %s952_s3 }
 0x58a   :  { %v879_v39 = vpop.permute.xlu1 %878 }
 0x58b   :  { %v881_v13 = vunpack.i.h.bf16 %v879_v39  ;;  %v880_v14 = vunpack.i.l.bf16 %v879_v39 }
 0x58c   :  { %479 = vrot.lane.b32.xlu1 %v474_v11, %s955_s2 }
 0x58e   :  { %v884_v38 = vpop.permute.xlu1 %883 }
 0x58f   :  { %v886_v15 = vunpack.i.h.bf16 %v884_v38  ;;  %v885_v16 = vunpack.i.l.bf16 %v884_v38 }
 0x590   :  { %487 = vrot.lane.b32.xlu1 %v470_v30, %s956_s22 }
 0x591   :  { %v709_v17 = vsel %vm424_vm3, %v880_v14, %v885_v16  ;;  %v710_v18 = vsel %vm424_vm3, %v881_v13, %v886_v15  ;;  %v404_v9 = vpop.permute.xlu0 %403 }
 0x592   :  { %v892_v49 = vpack.i.bf16 %v710_v18, %v709_v17 }
 0x594   :  { %893 = vrot.lane.b32.xlu1 %v892_v49, %s952_s3 }
 0x595   :  { %v412_v19 = vpop.permute.xlu0 %411 }
 0x596   :  { %v418_v23 = vsel %vm417_vm2, %v404_v9, %v412_v19 }
 0x597   :  { %v420_v27 = vmul.f32 %v418_v23, %v1263_v40 }
 0x599   :  { %v422_v36 = vadd.f32 %v420_v27, %v397_v28 }
 0x59b   :  { %v425_v46 = vsel %vm424_vm3, %v422_v36, %v1310_v42 }
 0x5e9   :  { %v478_v22 = vpop.permute.xlu0 %477 }
 0x5ed   :  { %v486_v24 = vpop.permute.xlu0 %485 }
 0x5ee   :  { %v491_v21 = vsel %vm417_vm2, %v478_v22, %v486_v24 }
 0x5ef   :  { %v493_v44 = vmul.f32 %v491_v21, %v1263_v40  ;;  %v472_v40 = vmul.f32 %v470_v30, %v1250_v32 }
 0x5f1   :  { %v495_v53 = vadd.f32 %v493_v44, %v471_v48 }
 0x5f3   :  { %v497_v31 = vsel %vm424_vm3, %v495_v53, %v1320_v54 }
 0x5f6   :  { %v406_v26 = vpop.permute.xlu1 %405 }
 0x5fa   :  { %v414_v29 = vpop.permute.xlu1 %413  ;;  %v889_v33 = vpop.permute.xlu0 %888 }
 0x5fb   :  { %v419_v35 = vsel %vm417_vm2, %v406_v26, %v414_v29  ;;  %v890_v41 = vunpack.i.l.bf16 %v889_v33  ;;  %v891_v63 = vunpack.i.h.bf16 %v889_v33 }
 0x5fc   :  { %v421_v8 = vmul.f32 %v419_v35, %v1271_v45 }
 0x5fd   :  { %v719_v47 = vsel %vm353_vm1, %v425_v46, %v890_v41 }
 0x5fe   :  { %v423_v43 = vadd.f32 %v421_v8, %v398_v37  ;;  %v480_v34 = vpop.permute.xlu1 %479 }
 0x600   :  { %v426_v20 = vsel %vm424_vm3, %v423_v43, %v396_v62 }
 0x601   :  { %v720_v25 = vsel %vm353_vm1, %v426_v20, %v891_v63 }
 0x602   :  { %v818_v50 = vpack.c.bf16 %v720_v25, %v719_v47  ;;  %v488_v51 = vpop.permute.xlu1 %487 }
 0x603   :  { %v492_v52 = vsel %vm417_vm2, %v480_v34, %v488_v51 }
 0x604   :  { %819 = vst [vmem:[%s1383_s11] sm:$0xff] %v818_v50   ;;  %v494_v42 = vmul.f32 %v492_v52, %v1271_v45 }
 0x606   :  { %v496_v55 = vadd.f32 %v494_v42, %v472_v40  ;;  %v894_v56 = vpop.permute.xlu1 %893 }
 0x607   :  { %v896_v57 = vunpack.i.h.bf16 %v894_v56  ;;  %v895_v58 = vunpack.i.l.bf16 %v894_v56 }
 0x608   :  { %v498_v60 = vsel %vm424_vm3, %v496_v55, %v470_v30 }
 0x609   :  { %v739_v61 = vsel %vm353_vm1, %v497_v31, %v895_v58  ;;  %v740_v59 = vsel %vm353_vm1, %v498_v60, %v896_v57 }
 0x60a   :  { %v823_v62 = vpack.c.bf16 %v740_v59, %v739_v61 }
 0x60c   :  { %824 = vst [vmem:[%s1384_s12] sm:$0xff] %v823_v62  }

// kernel: fuyu_forward.15
= control target key start
LH: loop header
LB: loop body
LE: loop exit
PB: predicated region body
PF: predicated region fallthrough
CT: control target
= control target key end

     0   :  { %s145_s0 = inlined_call_operand.vmem [shape: f32[16,128], index: 0, kind: input, shape index: {}]   ;;  %s146_s1 = inlined_call_operand.vmem [shape: f32[1,128], index: 1, kind: input, shape index: {}]   ;;  %s147_s2 = inlined_call_operand.vmem [shape: f32[1,128], index: 2, kind: input, shape index: {}]   ;;  %s148_s3 = inlined_call_operand.hbm [shape: f32[16,128], index: 3, kind: output, shape index: {}]  }
   0x1   :  { %v15_v0 = vld [vmem:[%s145_s0] sm:$0xff] }
   0x2   :  { %8 = vsyncpa [#allocation3], 0  ;;  %19 = vadd.xlane.f32.xlu0 %v15_v0  ;;  %v16_v1 = vld [vmem:[%s145_s0 + $0x8] sm:$0xff]  ;;  %v76_v17 = vld [vmem:[%s146_s1] ss:$0 sm:$0xff]  ;;  %s107_s19 = smov [#allocation2]  }
   0x3   :  { %v77_v19 = vld [vmem:[%s147_s2] ss:$0 sm:$0xff]  ;;  %s65_s20 = sshll.u32 %s107_s19, 4  ;;  %s66_s20 = int_to_ptr.vmem [resolvable:$true] %s65_s20 }
   0x4   :  { %s85_s21 = scalar_lea.vmem %s66_s20, 256  ;;  %p90_p1 = scmp.lt.s32.totalorder %s66_s20, %s66_s20 }
   0x5   :  { %p86_p0 = scmp.ne.s32.totalorder %s66_s20, %s85_s21  ;;  %p91_p2 = scmp.lt.s32.totalorder %s85_s21, %s85_s21 }
   0x6   :  { %21 = vadd.xlane.f32.xlu0 %v16_v1 }
   0x7   :  { %p92_p3 = por %p91_p2, %p90_p1 }
   0x9   :  { %p93_p4 = pnand %p92_p3, %p86_p0 }
  0x8b   :  { %v20_v2 = vpop.xlane.xlu0 %19 }
  0x8c   :  { %v24_v3 = vmul.f32 0.0078125, %v20_v2 }
  0x8e   :  { %v26_v4 = vsub.f32 %v15_v0, %v24_v3 }
  0x8f   :  { %v22_v5 = vpop.xlane.xlu0 %21 }
  0x90   :  { %v25_v6 = vmul.f32 0.0078125, %v22_v5  ;;  %v28_v7 = vmul.f32 %v26_v4, %v26_v4 }
  0x92   :  { %v27_v8 = vsub.f32 %v16_v1, %v25_v6  ;;  %30 = vadd.xlane.f32.xlu1 %v28_v7 }
  0x94   :  { %v29_v9 = vmul.f32 %v27_v8, %v27_v8 }
  0x96   :  { %32 = vadd.xlane.f32.xlu1 %v29_v9 }
 0x11b   :  { %v31_v10 = vpop.xlane.xlu1 %30 }
 0x11c   :  { %v34_v11 = vmul.f32 0.0078125, %v31_v10 }
 0x11e   :  { %v36_v12 = vadd.f32 1e-05, %v34_v11 }
 0x11f   :  { %v33_v13 = vpop.xlane.xlu1 %32 }
 0x120   :  { %81 = vrsqrt.f32 %v36_v12  ;;  %v35_v14 = vmul.f32 0.0078125, %v33_v13 }
 0x122   :  { %v37_v15 = vadd.f32 1e-05, %v35_v14 }
 0x124   :  { %83 = vrsqrt.f32 %v37_v15 }
 0x12d   :  { %v82_v16 = vpop.eup %81 }
 0x12e   :  { %v40_v18 = vmul.f32 %v82_v16, %v26_v4 }
 0x130   :  { %v48_v20 = vmul.f32 %v76_v17, %v40_v18 }
 0x131   :  { %v84_v21 = vpop.eup %83 }
 0x132   :  { %v41_v22 = vmul.f32 %v84_v21, %v27_v8  ;;  %v56_v23 = vadd.f32 %v77_v19, %v48_v20 }
 0x134   :  { %v49_v24 = vmul.f32 %v76_v17, %v41_v22  ;;  %58 = vst [vmem:[#allocation2] sm:$0xff] %v56_v23 }
 0x136   :  { %v57_v25 = vadd.f32 %v77_v19, %v49_v24 }
 0x138   :  { %59 = vst [vmem:[#allocation2 + $0x8] sm:$0xff] %v57_v25 }
 0x139   :  { %96 = shalt.err (!%p93_p4)
}
 0x13a   :  { %s108_s1 = smov 128   ;;  %s109_s2 = smov 8  }
 0x13b   :  { %71 = dma.vmem_to_hbm [thread:$0]  %s66_s20, 256, %s148_s3, [#allocation3], %s108_s1, %s108_s1, %s109_s2  }
 0x13c   :  { %105 = dma.done.wait [#allocation3], 256  }
 0x13d   :  { %106 = vsyncadd [#allocation3], 4294967040 }
 0x13e   :  { %75 = vsyncpa [#allocation3], 1 }

// kernel: fuyu_forward.11
= control target key start
LH: loop header
LB: loop body
LE: loop exit
PB: predicated region body
PF: predicated region fallthrough
CT: control target
= control target key end

     0   :  { %v1123_v0 = vmov 0.0   ;;  %vm1124_vm0 = vmmov 0   ;;  %v1125_v55 = vmov 0   ;;  %s1447_s2 = inlined_call_operand.vmem [shape: bf16[128,128], index: 2, kind: input, shape index: {}]   ;;  %s1448_s0 = inlined_call_operand.vmem [shape: bf16[16,128], index: 0, kind: input, shape index: {}]   ;;  %s1449_s1 = inlined_call_operand.vmem [shape: f32[16,128], index: 1, kind: input, shape index: {}]   ;;  %s1450_s3 = inlined_call_operand.vmem [shape: f32[1,128], index: 3, kind: input, shape index: {}]   ;;  %s1451_s6 = inlined_call_operand.vmem [shape: bf16[128,512], index: 6, kind: input, shape index: {}]   ;;  %s1452_s8 = inlined_call_operand.vmem [shape: bf16[512,128], index: 8, kind: input, shape index: {}]   ;;  %s1453_s4 = inlined_call_operand.vmem [shape: f32[1,128], index: 4, kind: input, shape index: {}]   ;;  %s1454_s5 = inlined_call_operand.vmem [shape: f32[1,128], index: 5, kind: input, shape index: {}]   ;;  %s1455_s7 = inlined_call_operand.vmem [shape: f32[1,512], index: 7, kind: input, shape index: {}]   ;;  %s1456_s9 = inlined_call_operand.vmem [shape: f32[1,128], index: 9, kind: input, shape index: {}]   ;;  %s1457_s10 = inlined_call_operand.vmem [shape: f32[16,128], index: 10, kind: output, shape index: {}]  }
   0x1   :  { %1007 = vmatprep.subr.bf16.mxu0 %v1123_v0  ;;  %v1030_v1 = vld [vmem:[%s1447_s2 + $0x38] sm:$0xff]   ;;  %1023 = vmatprep.mubr.msk.bf16.mxu0 %vm1124_vm0, %v1123_v0  ;;  %v1031_v2 = vld [vmem:[%s1447_s2 + $0x30] sm:$0xff]   ;;  %v1032_v3 = vld [vmem:[%s1447_s2 + $0x28] sm:$0xff]  }
   0x2   :  { %1008 = vmatpush3.bf16.msra.mxu0 %v1030_v1  ;;  %v1033_v4 = vld [vmem:[%s1447_s2 + $0x20] sm:$0xff]   ;;  %v1034_v5 = vld [vmem:[%s1447_s2 + $0x18] sm:$0xff]   ;;  %v1035_v6 = vld [vmem:[%s1447_s2 + $0x10] sm:$0xff]   ;;  %450 = vmatprep.mubr.bf16.mxu1 %v1125_v55 }
   0x3   :  { %1009 = vmatprep.subr.bf16.mxu0 %v1123_v0  ;;  %v1036_v7 = vld [vmem:[%s1447_s2 + $0x8] sm:$0xff]   ;;  %v1037_v8 = vld [vmem:[%s1447_s2] sm:$0xff]   ;;  %v1087_v62 = vld [vmem:[%s1452_s8 + $0x78] sm:$0xff]  }
   0x4   :  { %v1038_v9 = vld [vmem:[%s1448_s0] sm:$0xff]   ;;  %v39_v15 = vld [vmem:[%s1449_s1 + $0x8] sm:$0xff]  ;;  %v1088_v63 = vld [vmem:[%s1452_s8 + $0xf8] sm:$0xff]  }
   0x5   :  { %v38_v10 = vld [vmem:[%s1449_s1] sm:$0xff]  ;;  %v1041_v22 = vld [vmem:[%s1451_s6 + $0xe8] ss:$16 sps:$4 sm:$0xff]   ;;  %v1043_v23 = vld [vmem:[%s1451_s6 + $0xec] ss:$16 sps:$4 sm:$0xff]  }
   0x6   :  { %1010 = vmatpush3.bf16.msra.mxu0 %v1031_v2  ;;  %v886_v12 = vld [vmem:[%s1450_s3] ss:$0 sm:$0xff]  ;;  %v1039_v21 = vld [vmem:[%s1451_s6 + $0xe4] ss:$16 sps:$4 sm:$0xff]   ;;  %v1049_v34 = vld [vmem:[%s1451_s6 + $0xcc] ss:$16 sps:$4 sm:$0xff]  }
   0x7   :  { %1011 = vmatprep.subr.bf16.mxu0 %v1123_v0  ;;  %418 = vmatprep.subr.bf16.mxu1 %v1039_v21  ;;  %v1044_v24 = vld [vmem:[%s1451_s6 + $0xe0] ss:$16 sps:$4 sm:$0xff]   ;;  %v1045_v33 = vld [vmem:[%s1451_s6 + $0xc4] ss:$16 sps:$4 sm:$0xff]   ;;  %v1047_v35 = vld [vmem:[%s1451_s6 + $0xc8] ss:$16 sps:$4 sm:$0xff]  }
   0x8   :  { %419 = vmatpush1.bf16.msra.mxu1 %v1044_v24  ;;  %v1050_v36 = vld [vmem:[%s1451_s6 + $0xc0] ss:$16 sps:$4 sm:$0xff]   ;;  %v1051_v37 = vld [vmem:[%s1451_s6 + $0xa4] ss:$16 sps:$4 sm:$0xff]   ;;  %v1055_v38 = vld [vmem:[%s1451_s6 + $0xac] ss:$16 sps:$4 sm:$0xff]  }
   0x9   :  { %420 = vmatprep.subr.bf16.mxu1 %v1045_v33  ;;  %v1053_v39 = vld [vmem:[%s1451_s6 + $0xa8] ss:$16 sps:$4 sm:$0xff]   ;;  %v1056_v40 = vld [vmem:[%s1451_s6 + $0xa0] ss:$16 sps:$4 sm:$0xff]   ;;  %v1057_v41 = vld [vmem:[%s1451_s6 + $0x84] ss:$16 sps:$4 sm:$0xff]  }
   0xa   :  { %1012 = vmatpush3.bf16.msra.mxu0 %v1032_v3  ;;  %v1059_v42 = vld [vmem:[%s1451_s6 + $0x88] ss:$16 sps:$4 sm:$0xff]   ;;  %v1061_v43 = vld [vmem:[%s1451_s6 + $0x8c] ss:$16 sps:$4 sm:$0xff]   ;;  %v1062_v44 = vld [vmem:[%s1451_s6 + $0x80] ss:$16 sps:$4 sm:$0xff]  }
   0xb   :  { %1013 = vmatprep.subr.bf16.mxu0 %v1123_v0  ;;  %v1063_v45 = vld [vmem:[%s1451_s6 + $0x64] ss:$16 sps:$4 sm:$0xff]   ;;  %v1067_v46 = vld [vmem:[%s1451_s6 + $0x6c] ss:$16 sps:$4 sm:$0xff]   ;;  %v1065_v47 = vld [vmem:[%s1451_s6 + $0x68] ss:$16 sps:$4 sm:$0xff]  }
   0xc   :  { %421 = vmatpush1.bf16.msra.mxu1 %v1050_v36  ;;  %v1068_v48 = vld [vmem:[%s1451_s6 + $0x60] ss:$16 sps:$4 sm:$0xff]   ;;  %v1069_v49 = vld [vmem:[%s1451_s6 + $0x44] ss:$16 sps:$4 sm:$0xff]   ;;  %v1073_v50 = vld [vmem:[%s1451_s6 + $0x4c] ss:$16 sps:$4 sm:$0xff]  }
   0xd   :  { %422 = vmatprep.subr.bf16.mxu1 %v1051_v37  ;;  %v1071_v51 = vld [vmem:[%s1451_s6 + $0x48] ss:$16 sps:$4 sm:$0xff]   ;;  %v1074_v52 = vld [vmem:[%s1451_s6 + $0x40] ss:$16 sps:$4 sm:$0xff]   ;;  %v1075_v53 = vld [vmem:[%s1451_s6 + $0x24] ss:$16 sps:$4 sm:$0xff]  }
   0xe   :  { %1014 = vmatpush3.bf16.msra.mxu0 %v1033_v4  ;;  %v1079_v54 = vld [vmem:[%s1451_s6 + $0x2c] ss:$16 sps:$4 sm:$0xff]   ;;  %v1077_v56 = vld [vmem:[%s1451_s6 + $0x28] ss:$16 sps:$4 sm:$0xff]   ;;  %v1080_v57 = vld [vmem:[%s1451_s6 + $0x20] ss:$16 sps:$4 sm:$0xff]  }
   0xf   :  { %1015 = vmatprep.subr.bf16.mxu0 %v1123_v0  ;;  %v1081_v58 = vld [vmem:[%s1451_s6 + $0x4] ss:$16 sps:$4 sm:$0xff]   ;;  %v1085_v59 = vld [vmem:[%s1451_s6 + $0xc] ss:$16 sps:$4 sm:$0xff]   ;;  %v1083_v60 = vld [vmem:[%s1451_s6 + $0x8] ss:$16 sps:$4 sm:$0xff]  }
  0x10   :  { %423 = vmatpush1.bf16.msra.mxu1 %v1056_v40  ;;  %v1086_v61 = vld [vmem:[%s1451_s6] ss:$16 sps:$4 sm:$0xff]   ;;  %v1103_v33 = vld [vmem:[%s1452_s8 + $0x58] sm:$0xff]  }
  0x11   :  { %424 = vmatprep.subr.bf16.mxu1 %v1057_v41  ;;  %v1091_v21 = vld [vmem:[%s1452_s8 + $0x70] sm:$0xff]   ;;  %v1106_v36 = vld [vmem:[%s1452_s8 + $0x98] sm:$0xff]   ;;  %v1111_v41 = vld [vmem:[%s1452_s8 + $0x48] sm:$0xff]  }
  0x12   :  { %1016 = vmatpush3.bf16.msra.mxu0 %v1034_v5  ;;  %v1094_v24 = vld [vmem:[%s1452_s8 + $0xb0] sm:$0xff]  }
  0x13   :  { %1017 = vmatprep.subr.bf16.mxu0 %v1123_v0  ;;  %v1107_v37 = vld [vmem:[%s1452_s8 + $0x50] sm:$0xff]  }
  0x14   :  { %425 = vmatpush1.bf16.msra.mxu1 %v1062_v44  ;;  %v1110_v40 = vld [vmem:[%s1452_s8 + $0x90] sm:$0xff]   ;;  %v1114_v44 = vld [vmem:[%s1452_s8 + $0x88] sm:$0xff]  }
  0x15   :  { %426 = vmatprep.subr.bf16.mxu1 %v1063_v45  ;;  %v1115_v45 = vld [vmem:[%s1452_s8 + $0x40] sm:$0xff]  }
  0x16   :  { %1018 = vmatpush3.bf16.msra.mxu0 %v1035_v6 }
  0x17   :  { %1019 = vmatprep.subr.bf16.mxu0 %v1123_v0 }
  0x18   :  { %427 = vmatpush1.bf16.msra.mxu1 %v1068_v48  ;;  %v1118_v48 = vld [vmem:[%s1452_s8 + $0x80] sm:$0xff]  }
  0x19   :  { %428 = vmatprep.subr.bf16.mxu1 %v1069_v49  ;;  %v238_v49 = vlaneseq }
  0x1a   :  { %1020 = vmatpush3.bf16.msra.mxu0 %v1036_v7 }
  0x1b   :  { %1021 = vmatprep.subr.bf16.mxu0 %v1123_v0 }
  0x1c   :  { %429 = vmatpush1.bf16.msra.mxu1 %v1074_v52 }
  0x1d   :  { %430 = vmatprep.subr.bf16.mxu1 %v1075_v53 }
  0x1e   :  { %1022 = vmatpush3.bf16.msra.mxu0 %v1037_v8  ;;  %v887_v8 = vld [vmem:[%s1453_s4] ss:$0 sm:$0xff] }
  0x1f   :  { %461 = vmatprep.subr.bf16.mxu0 %v1043_v23  ;;  %v1093_v23 = vld [vmem:[%s1452_s8 + $0x30] sm:$0xff]  }
  0x20   :  { %431 = vmatpush1.bf16.msra.mxu1 %v1080_v57 }
  0x21   :  { %1024 = vmatmul.mubr.bf16.vlgmr.msra.gmra.mxu0 %v1038_v9  ;;  %432 = vmatprep.subr.bf16.mxu1 %v1081_v58 }
  0x22   :  { %462 = vmatpush1.bf16.msra.mxu0 %v1041_v22  ;;  %493 = vmatprep.mubr.bf16.mxu0 %v1125_v55  ;;  %v1092_v22 = vld [vmem:[%s1452_s8 + $0xf0] sm:$0xff]   ;;  %v236_v55 = vld [vmem:[%s1455_s7] sm:$0xf] }
  0x23   :  { %463 = vmatprep.subr.bf16.mxu0 %v1049_v34  ;;  %v1104_v34 = vld [vmem:[%s1452_s8 + $0xd8] sm:$0xff]  }
  0x24   :  { %433 = vmatpush1.bf16.msra.mxu1 %v1086_v61 }
  0x25   :  { %963 = vmatprep.subr.bf16.mxu1 %v1087_v62 }
  0x26   :  { %464 = vmatpush1.bf16.msra.mxu0 %v1047_v35  ;;  %v1105_v35 = vld [vmem:[%s1452_s8 + $0x18] sm:$0xff]  }
  0x27   :  { %465 = vmatprep.subr.bf16.mxu0 %v1055_v38  ;;  %v1108_v38 = vld [vmem:[%s1452_s8 + $0xd0] sm:$0xff]  }
  0x2a   :  { %466 = vmatpush1.bf16.msra.mxu0 %v1053_v39  ;;  %v1109_v39 = vld [vmem:[%s1452_s8 + $0x10] sm:$0xff]  }
  0x2b   :  { %467 = vmatprep.subr.bf16.mxu0 %v1061_v43  ;;  %v1113_v43 = vld [vmem:[%s1452_s8 + $0x8] sm:$0xff]  }
  0x2e   :  { %468 = vmatpush1.bf16.msra.mxu0 %v1059_v42  ;;  %v1112_v42 = vld [vmem:[%s1452_s8 + $0xc8] sm:$0xff]  }
  0x2f   :  { %469 = vmatprep.subr.bf16.mxu0 %v1067_v46  ;;  %v1116_v46 = vld [vmem:[%s1452_s8 + $0xc0] sm:$0xff]  }
  0x32   :  { %470 = vmatpush1.bf16.msra.mxu0 %v1065_v47  ;;  %v1117_v47 = vld [vmem:[%s1452_s8] sm:$0xff]  }
  0x33   :  { %471 = vmatprep.subr.bf16.mxu0 %v1073_v50  ;;  %v239_v50 = vshrl.u32 %v238_v49, 7 }
  0x35   :  { %v252_v52 = vsub.s32 3, %v239_v50  ;;  %v240_v53 = vsub.s32 0, %v239_v50 }
  0x36   :  { %472 = vmatpush1.bf16.msra.mxu0 %v1071_v51  ;;  %v244_v51 = vsub.s32 1, %v239_v50 }
  0x37   :  { %473 = vmatprep.subr.bf16.mxu0 %v1079_v54  ;;  %v248_v54 = vsub.s32 2, %v239_v50  ;;  %v253_v57 = vrot.slane %v236_v55, %v252_v52  ;;  %v241_v58 = vrot.slane %v236_v55, %v240_v53 }
  0x3a   :  { %474 = vmatpush1.bf16.msra.mxu0 %v1077_v56  ;;  %v245_v56 = vrot.slane %v236_v55, %v244_v51 }
  0x3b   :  { %475 = vmatprep.subr.bf16.mxu0 %v1085_v59 }
  0x3e   :  { %476 = vmatpush1.bf16.msra.mxu0 %v1083_v60  ;;  %v249_v60 = vrot.slane %v236_v55, %v248_v54 }
  0x3f   :  { %985 = vmatprep.subr.bf16.mxu0 %v1088_v63 }
  0xe1   :  { %v144_v11 = vpop.f32.mrf.mxu0 }
  0xe2   :  { %v151_v13 = vadd.f32 %v144_v11, %v38_v10 }
  0xe3   :  { %v1025_v14 = vpop.f32.mrf.mxu0 }
  0xe4   :  { %v1217_v16 = vadd.f32 %v886_v12, %v151_v13 }
  0xe5   :  { %v147_v17 = vpop.f32.mrf.mxu0 }
  0xe6   :  { %v152_v18 = vadd.f32 %v147_v17, %v39_v15  ;;  %164 = vadd.xlane.f32.xlu0 %v1217_v16  ;;  %v1089_v17 = vld [vmem:[%s1452_s8 + $0x38] sm:$0xff]  }
  0xe7   :  { %v1026_v19 = vpop.f32.mrf.mxu0 }
  0xe8   :  { %v1220_v20 = vadd.f32 %v886_v12, %v152_v18  ;;  %v888_v12 = vld [vmem:[%s1454_s5] ss:$0 sm:$0xff]  ;;  %v1090_v18 = vld [vmem:[%s1452_s8 + $0xb8] sm:$0xff]  }
  0xea   :  { %166 = vadd.xlane.f32.xlu0 %v1220_v20 }
 0x16f   :  { %v165_v25 = vpop.xlane.xlu0 %164 }
 0x170   :  { %v169_v26 = vmul.f32 0.0078125, %v165_v25  ;;  %v1095_v25 = vld [vmem:[%s1452_s8 + $0x68] sm:$0xff]  }
 0x172   :  { %v1236_v27 = vsub.f32 %v1217_v16, %v169_v26  ;;  %v1096_v26 = vld [vmem:[%s1452_s8 + $0xe8] sm:$0xff]  }
 0x173   :  { %v167_v28 = vpop.xlane.xlu0 %166 }
 0x174   :  { %v170_v29 = vmul.f32 0.0078125, %v167_v28  ;;  %v173_v30 = vmul.f32 %v1236_v27, %v1236_v27  ;;  %v1098_v28 = vld [vmem:[%s1452_s8 + $0xa8] sm:$0xff]  }
 0x176   :  { %v1241_v31 = vsub.f32 %v1220_v20, %v170_v29  ;;  %175 = vadd.xlane.f32.xlu1 %v173_v30  ;;  %v1099_v29 = vld [vmem:[%s1452_s8 + $0x60] sm:$0xff]  }
 0x177   :  { %v1100_v30 = vld [vmem:[%s1452_s8 + $0xe0] sm:$0xff]  }
 0x178   :  { %v174_v32 = vmul.f32 %v1241_v31, %v1241_v31 }
 0x17a   :  { %177 = vadd.xlane.f32.xlu1 %v174_v32  ;;  %v1102_v32 = vld [vmem:[%s1452_s8 + $0xa0] sm:$0xff]  }
 0x1ff   :  { %v176_v0 = vpop.xlane.xlu1 %175 }
 0x200   :  { %v179_v1 = vmul.f32 0.0078125, %v176_v0 }
 0x202   :  { %v181_v2 = vadd.f32 1e-05, %v179_v1 }
 0x203   :  { %v178_v3 = vpop.xlane.xlu1 %177 }
 0x204   :  { %1119 = vrsqrt.f32 %v181_v2  ;;  %v180_v4 = vmul.f32 0.0078125, %v178_v3 }
 0x206   :  { %v182_v5 = vadd.f32 1e-05, %v180_v4 }
 0x208   :  { %1121 = vrsqrt.f32 %v182_v5 }
 0x211   :  { %v1120_v6 = vpop.eup %1119 }
 0x212   :  { %v185_v7 = vmul.f32 %v1120_v6, %v1236_v27  ;;  %v1097_v27 = vld [vmem:[%s1452_s8 + $0x28] sm:$0xff]  }
 0x214   :  { %v193_v11 = vmul.f32 %v887_v8, %v185_v7 }
 0x215   :  { %v1122_v9 = vpop.eup %1121 }
 0x216   :  { %v186_v10 = vmul.f32 %v1122_v9, %v1241_v31  ;;  %v201_v14 = vadd.f32 %v888_v12, %v193_v11  ;;  %v1101_v31 = vld [vmem:[%s1452_s8 + $0x20] sm:$0xff]  }
 0x218   :  { %v194_v13 = vmul.f32 %v887_v8, %v186_v10 }
 0x21a   :  { %v202_v15 = vadd.f32 %v888_v12, %v194_v13 }
 0x21c   :  { %v235_v19 = vpack.c.bf16 %v202_v15, %v201_v14 }
 0x21e   :  { %451 = vmatmul.mubr.bf16.vlgmr.msra.gmra.mxu1 %v235_v19  ;;  %494 = vmatmul.mubr.bf16.vlgmr.msra.gmra.mxu0 %v235_v19 }
 0x21f   :  { %964 = vmatpush3.bf16.msra.mxu1 %v1089_v17  ;;  %986 = vmatpush3.bf16.msra.mxu0 %v1090_v18 }
 0x220   :  { %965 = vmatprep.subr.bf16.mxu1 %v1091_v21  ;;  %987 = vmatprep.subr.bf16.mxu0 %v1092_v22 }
 0x223   :  { %966 = vmatpush3.bf16.msra.mxu1 %v1093_v23  ;;  %988 = vmatpush3.bf16.msra.mxu0 %v1094_v24 }
 0x224   :  { %967 = vmatprep.subr.bf16.mxu1 %v1095_v25  ;;  %989 = vmatprep.subr.bf16.mxu0 %v1096_v26 }
 0x227   :  { %968 = vmatpush3.bf16.msra.mxu1 %v1097_v27  ;;  %990 = vmatpush3.bf16.msra.mxu0 %v1098_v28 }
 0x228   :  { %969 = vmatprep.subr.bf16.mxu1 %v1099_v29  ;;  %991 = vmatprep.subr.bf16.mxu0 %v1100_v30 }
 0x22b   :  { %970 = vmatpush3.bf16.msra.mxu1 %v1101_v31  ;;  %992 = vmatpush3.bf16.msra.mxu0 %v1102_v32 }
 0x22c   :  { %971 = vmatprep.subr.bf16.mxu1 %v1103_v33  ;;  %993 = vmatprep.subr.bf16.mxu0 %v1104_v34 }
 0x22f   :  { %972 = vmatpush3.bf16.msra.mxu1 %v1105_v35  ;;  %994 = vmatpush3.bf16.msra.mxu0 %v1106_v36  ;;  %v921_v36 = vld [vmem:[%s1456_s9] ss:$0 sm:$0xff] }
 0x230   :  { %973 = vmatprep.subr.bf16.mxu1 %v1107_v37  ;;  %995 = vmatprep.subr.bf16.mxu0 %v1108_v38 }
 0x233   :  { %974 = vmatpush3.bf16.msra.mxu1 %v1109_v39  ;;  %996 = vmatpush3.bf16.msra.mxu0 %v1110_v40 }
 0x234   :  { %975 = vmatprep.subr.bf16.mxu1 %v1111_v41  ;;  %997 = vmatprep.subr.bf16.mxu0 %v1112_v42 }
 0x237   :  { %976 = vmatpush3.bf16.msra.mxu1 %v1113_v43  ;;  %998 = vmatpush3.bf16.msra.mxu0 %v1114_v44 }
 0x238   :  { %977 = vmatprep.subr.bf16.mxu1 %v1115_v45  ;;  %999 = vmatprep.subr.bf16.mxu0 %v1116_v46 }
 0x23b   :  { %978 = vmatpush3.bf16.msra.mxu1 %v1117_v47  ;;  %1000 = vmatpush3.bf16.msra.mxu0 %v1118_v48 }
 0x2de   :  { %v452_v59 = vpop.f32.mrf.mxu1  ;;  %v495_v61 = vpop.f32.mrf.mxu0 }
 0x2df   :  { %v453_v2 = vadd.f32 %v452_v59, %v241_v58  ;;  %v496_v3 = vadd.f32 %v495_v61, %v249_v60 }
 0x2e0   :  { %v454_v62 = vpop.f32.mrf.mxu1  ;;  %v497_v63 = vpop.f32.mrf.mxu0 }
 0x2e1   :  { %v455_v0 = vadd.f32 %v454_v62, %v245_v56  ;;  %v498_v1 = vadd.f32 %v497_v63, %v253_v57  ;;  %v504_v14 = vmax.f32 %v453_v2, 0.0  ;;  %v506_v15 = vmax.f32 %v496_v3, 0.0 }
 0x2e2   :  { %v456_v4 = vpop.f32.mrf.mxu1  ;;  %v499_v5 = vpop.f32.mrf.mxu0 }
 0x2e3   :  { %v457_v6 = vadd.f32 %v456_v4, %v241_v58  ;;  %v500_v7 = vadd.f32 %v499_v5, %v249_v60  ;;  %v505_v10 = vmax.f32 %v455_v0, 0.0  ;;  %v507_v11 = vmax.f32 %v498_v1, 0.0 }
 0x2e4   :  { %v458_v8 = vpop.f32.mrf.mxu1  ;;  %v501_v9 = vpop.f32.mrf.mxu0  ;;  %v512_v28 = vmul.f32 %v504_v14, %v504_v14  ;;  %v514_v29 = vmul.f32 %v506_v15, %v506_v15 }
 0x2e5   :  { %v459_v12 = vadd.f32 %v458_v8, %v245_v56  ;;  %v502_v13 = vadd.f32 %v501_v9, %v253_v57  ;;  %v508_v17 = vmax.f32 %v457_v6, 0.0  ;;  %v510_v18 = vmax.f32 %v500_v7, 0.0 }
 0x2e6   :  { %v513_v24 = vmul.f32 %v505_v10, %v505_v10  ;;  %v515_v25 = vmul.f32 %v507_v11, %v507_v11 }
 0x2e7   :  { %v509_v19 = vmax.f32 %v459_v12, 0.0  ;;  %v511_v21 = vmax.f32 %v502_v13, 0.0  ;;  %v516_v22 = vmul.f32 %v508_v17, %v508_v17  ;;  %v518_v23 = vmul.f32 %v510_v18, %v510_v18 }
 0x2e9   :  { %v517_v26 = vmul.f32 %v509_v19, %v509_v19  ;;  %v519_v27 = vmul.f32 %v511_v21, %v511_v21  ;;  %v584_v32 = vpack.c.bf16 %v516_v22, %v512_v28  ;;  %v586_v33 = vpack.c.bf16 %v518_v23, %v514_v29 }
 0x2eb   :  { %v585_v30 = vpack.c.bf16 %v517_v26, %v513_v24  ;;  %v587_v31 = vpack.c.bf16 %v519_v27, %v515_v25 }
 0x2ed   :  { %819 = vmatprep.mubr.bf16.mxu1 %v585_v30  ;;  %860 = vmatprep.mubr.bf16.mxu0 %v587_v31 }
 0x2ee   :  { %820 = vmatmul.mubr.bf16.vlgmr.msra.gmra.mxu1 %v584_v32  ;;  %861 = vmatmul.mubr.bf16.vlgmr.msra.gmra.mxu0 %v586_v33 }
 0x3ae   :  { %v979_v34 = vpop.f32.mrf.mxu1  ;;  %v1001_v35 = vpop.f32.mrf.mxu0 }
 0x3b0   :  { %v980_v37 = vpop.f32.mrf.mxu1  ;;  %v1002_v38 = vpop.f32.mrf.mxu0 }
 0x3b1   :  { %v981_v39 = vadd.f32 %v980_v37, %v979_v34  ;;  %v1003_v43 = vadd.f32 %v1002_v38, %v1001_v35 }
 0x3b2   :  { %v982_v40 = vpop.f32.mrf.mxu1  ;;  %v1004_v41 = vpop.f32.mrf.mxu0 }
 0x3b3   :  { %v822_v42 = vadd.f32 %v981_v39, %v921_v36 }
 0x3b4   :  { %v983_v44 = vpop.f32.mrf.mxu1  ;;  %v1005_v45 = vpop.f32.mrf.mxu0 }
 0x3b5   :  { %v863_v46 = vadd.f32 %v1003_v43, %v822_v42  ;;  %v984_v47 = vadd.f32 %v983_v44, %v982_v40  ;;  %v1006_v50 = vadd.f32 %v1005_v45, %v1004_v41 }
 0x3b7   :  { %v869_v48 = vadd.f32 %v863_v46, %v1217_v16  ;;  %v825_v49 = vadd.f32 %v984_v47, %v921_v36 }
 0x3b9   :  { %871 = vst [vmem:[%s1457_s10] sm:$0xff] %v869_v48  ;;  %v866_v51 = vadd.f32 %v1006_v50, %v825_v49 }
 0x3bb   :  { %v870_v52 = vadd.f32 %v866_v51, %v1220_v20 }
 0x3bd   :  { %872 = vst [vmem:[%s1457_s10 + $0x8] sm:$0xff] %v870_v52 }

</bundles_post_ra>
